<compile_context>
chip_gen: v7x
topology: tpu7x:2x2x1
jax: 0.10.0
libtpu: 0.0.40
codegen_flags: <defaults>
</compile_context>

<pallas_src>
import functools

import jax
import jax.numpy as jnp
import numpy as np
from jax import lax
from jax.experimental import pallas as pl
from jax.experimental.pallas import tpu as pltpu


# ----------------------------- kernel ---------------------------------------

def _attn_kernel(q_ref, k_ref, v_ref, bias_ref, wout_ref, gamma_ref, beta_ref,
                 out_ref, m_scr, l_scr, acc_scr, *, num_heads, head_dim, eps):
    """One (batch, q-tile) row block; kv-tiles stream along grid axis 2.

    q_ref:    (tile_q, H)           -- all heads packed on lanes
    k_ref/v_ref: (tile_k, H)
    bias_ref: (num_heads, tile_q, tile_k)
    wout_ref: (H, H)  (in, out) layout
    gamma_ref/beta_ref: (1, H)
    out_ref:  (tile_q, H)
    scratch:  m (NH, tq, 1), l (NH, tq, 1), acc (NH, tq, D)
    """
    j = pl.program_id(2)
    nj = pl.num_programs(2)

    @pl.when(j == 0)
    def _init():
        m_scr[...] = jnp.full(m_scr.shape, -jnp.inf, dtype=m_scr.dtype)
        l_scr[...] = jnp.zeros(l_scr.shape, dtype=l_scr.dtype)
        acc_scr[...] = jnp.zeros(acc_scr.shape, dtype=acc_scr.dtype)

    q = q_ref[...]
    k = k_ref[...]
    v = v_ref[...]

    # Static (unrolled) loop over heads; every matmul is a plain 2-D MXU dot.
    for h in range(num_heads):
        sl = slice(h * head_dim, (h + 1) * head_dim)
        qh = q[:, sl]                                   # (tq, D)
        kh = k[:, sl]                                   # (tk, D)
        vh = v[:, sl]                                   # (tk, D)

        # scores = q_h @ k_h^T  (explicit-bias path of the module: no scaling)
        s = lax.dot_general(qh, kh, (((1,), (1,)), ((), ())),
                            preferred_element_type=jnp.float32)
        s = s + bias_ref[h]                             # (tq, tk)

        m_prev = m_scr[h]                               # (tq, 1)
        l_prev = l_scr[h]                               # (tq, 1)
        m_new = jnp.maximum(m_prev, jnp.max(s, axis=-1, keepdims=True))
        alpha = jnp.exp(m_prev - m_new)
        p = jnp.exp(s - m_new)                          # (tq, tk) f32
        l_scr[h] = alpha * l_prev + jnp.sum(p, axis=-1, keepdims=True)
        acc_scr[h] = alpha * acc_scr[h] + jnp.dot(
            p.astype(vh.dtype), vh, preferred_element_type=jnp.float32)
        m_scr[h] = m_new

    # Fused epilogue: softmax-normalise, LayerNorm over H, out_proj.
    @pl.when(j == nj - 1)
    def _finalize():
        heads = []
        for h in range(num_heads):
            heads.append(acc_scr[h] / l_scr[h])         # (tq, D)
        o = jnp.concatenate(heads, axis=-1)             # (tq, H), head-major

        mu = jnp.mean(o, axis=-1, keepdims=True)
        var = jnp.mean(jnp.square(o - mu), axis=-1, keepdims=True)
        xn = (o - mu) * lax.rsqrt(var + eps)
        y = xn * gamma_ref[...] + beta_ref[...]         # (tq, H)

        out_ref[...] = jnp.dot(
            y, wout_ref[...], preferred_element_type=jnp.float32
        ).astype(out_ref.dtype)


# ----------------------------- wrapper ---------------------------------------

def _pick_tile(total, target, mult):
    """Largest divisor of `total` that is <= target and a multiple of `mult`,
    falling back to the full extent (always legal for BlockSpec)."""
    if total <= target:
        return total
    for cand in range(min(target, total), 0, -1):
        if total % cand == 0 and cand % mult == 0:
            return cand
    return total


def mem_eff_invariant_attention(q, k, v, attn_bias, w_out, ln_gamma, ln_beta,
                                *, num_heads, eps=1e-5,
                                tile_q_target=256, tile_k_target=512):
    """q, k, v: (B, T, H) / (B, S, H); attn_bias: (B, NH, T, S);
    w_out: (H, H) in (in, out) layout; ln_gamma/ln_beta: (1, H).
    Returns (B, T, H)."""
    B, T, H = q.shape
    S = k.shape[1]
    assert k.shape == (B, S, H) and v.shape == (B, S, H)
    assert H % num_heads == 0
    head_dim = H // num_heads
    assert attn_bias.shape == (B, num_heads, T, S)
    assert w_out.shape == (H, H)

    # Large tiles: q-tile second-to-last dim must be a multiple of 8 (or full),
    # kv-tile is the last dim of the bias block -> multiple of 128 (or full).
    tile_q = _pick_tile(T, tile_q_target, 8)
    tile_k = _pick_tile(S, tile_k_target, 128)
    grid = (B, T // tile_q, S // tile_k)

    kernel = functools.partial(_attn_kernel, num_heads=num_heads,
                               head_dim=head_dim, eps=eps)

    return pl.pallas_call(
        kernel,
        out_shape=jax.ShapeDtypeStruct((B, T, H), q.dtype),
        grid_spec=pltpu.PrefetchScalarGridSpec(
            num_scalar_prefetch=0,
            grid=grid,
            in_specs=[
                pl.BlockSpec((None, tile_q, H), lambda b, i, j: (b, i, 0)),
                pl.BlockSpec((None, tile_k, H), lambda b, i, j: (b, j, 0)),
                pl.BlockSpec((None, tile_k, H), lambda b, i, j: (b, j, 0)),
                pl.BlockSpec((None, num_heads, tile_q, tile_k),
                             lambda b, i, j: (b, 0, i, j)),
                pl.BlockSpec((H, H), lambda b, i, j: (0, 0)),
                pl.BlockSpec((1, H), lambda b, i, j: (0, 0)),
                pl.BlockSpec((1, H), lambda b, i, j: (0, 0)),
            ],
            out_specs=pl.BlockSpec((None, tile_q, H), lambda b, i, j: (b, i, 0)),
            scratch_shapes=[
                pltpu.VMEM((num_heads, tile_q, 1), jnp.float32),        # m
                pltpu.VMEM((num_heads, tile_q, 1), jnp.float32),        # l
                pltpu.VMEM((num_heads, tile_q, head_dim), jnp.float32), # acc
            ],
        ),
        compiler_params=pltpu.CompilerParams(
            dimension_semantics=("parallel", "parallel", "arbitrary")),
    )(q, k, v, attn_bias, w_out, ln_gamma, ln_beta)


# ------------------------- pure-JAX reference --------------------------------

def reference(q, k, v, attn_bias, w_out, ln_gamma, ln_beta, num_heads,
              eps=1e-5):
    B, T, H = q.shape
    S = k.shape[1]
    D = H // num_heads
    qh = q.reshape(B, T, num_heads, D).transpose(0, 2, 1, 3)
    kh = k.reshape(B, S, num_heads, D).transpose(0, 2, 1, 3)
    vh = v.reshape(B, S, num_heads, D).transpose(0, 2, 1, 3)

    s = jnp.einsum("bhqd,bhkd->bhqk", qh, kh) + attn_bias   # no scaling
    p = jax.nn.softmax(s.astype(jnp.float32), axis=-1)
    attn = jnp.einsum("bhqk,bhkd->bhqd", p.astype(vh.dtype), vh)
    attn = attn.transpose(0, 2, 1, 3).reshape(B, T, H)

    mu = jnp.mean(attn, axis=-1, keepdims=True)
    var = jnp.mean(jnp.square(attn - mu), axis=-1, keepdims=True)
    xn = (attn - mu) * lax.rsqrt(var + eps)
    y = xn * ln_gamma + ln_beta
    return y @ w_out


# ------------------------------- demo -----------------------------------------

if __name__ == "__main__":
    B, T, H, NH = 2, 8, 32, 4           # small synthetic shapes (head_dim = 8)
    key = jax.random.PRNGKey(0)
    kq, kk, kv, kb, kw, kg, kbe = jax.random.split(key, 7)

    q = jax.random.normal(kq, (B, T, H), jnp.float32)
    k = jax.random.normal(kk, (B, T, H), jnp.float32)
    v = jax.random.normal(kv, (B, T, H), jnp.float32)
    attn_bias = 0.5 * jax.random.normal(kb, (B, NH, T, T), jnp.float32)

    # out_proj weight stored transposed relative to torch: (in, out)
    w_out = jax.random.normal(kw, (H, H), jnp.float32) / np.sqrt(H)
    ln_gamma = 1.0 + 0.1 * jax.random.normal(kg, (1, H), jnp.float32)
    ln_beta = 0.01 * jax.random.normal(kbe, (1, H), jnp.float32)

    out = mem_eff_invariant_attention(q, k, v, attn_bias, w_out, ln_gamma,
                                      ln_beta, num_heads=NH)
    out = jax.block_until_ready(out)

    ref = reference(q, k, v, attn_bias, w_out, ln_gamma, ln_beta, NH)
    np.testing.assert_allclose(np.asarray(out), np.asarray(ref),
                               rtol=1e-4, atol=1e-4)

    print("KERNEL_OK")
</pallas_src>

<mosaic_0001>
module attributes {stable_mosaic.version = 11 : i64} {
  func.func @_attn_kernel(%arg0: i32, %arg1: i32, %arg2: i32, %arg3: memref<1x8x32xf32, #tpu.memory_space<vmem>>, %arg4: memref<1x8x32xf32, #tpu.memory_space<vmem>>, %arg5: memref<1x8x32xf32, #tpu.memory_space<vmem>>, %arg6: memref<1x4x8x8xf32, #tpu.memory_space<vmem>>, %arg7: memref<32x32xf32, #tpu.memory_space<vmem>>, %arg8: memref<1x32xf32, #tpu.memory_space<vmem>>, %arg9: memref<1x32xf32, #tpu.memory_space<vmem>>, %arg10: memref<1x8x32xf32, #tpu.memory_space<vmem>>, %arg11: memref<4x8x1xf32, #tpu.memory_space<vmem>>, %arg12: memref<4x8x1xf32, #tpu.memory_space<vmem>>, %arg13: memref<4x8x8xf32, #tpu.memory_space<vmem>>) attributes {dimension_semantics = [#tpu.dimension_semantics<parallel>, #tpu.dimension_semantics<parallel>, #tpu.dimension_semantics<arbitrary>], iteration_bounds = array<i64: 2, 1, 1>, scalar_prefetch = 0 : i64, scratch_operands = 3 : i64, tpu.core_type = #tpu.core_type<tc>, window_params = [{transform_indices = @transform_0, window_bounds = array<i64: 1, 8, 32>}, {transform_indices = @transform_1, window_bounds = array<i64: 1, 8, 32>}, {transform_indices = @transform_2, window_bounds = array<i64: 1, 8, 32>}, {transform_indices = @transform_3, window_bounds = array<i64: 1, 4, 8, 8>}, {pipeline_mode = #tpu.pipeline_mode<synchronous>, transform_indices = @transform_4, window_bounds = array<i64: 32, 32>}, {pipeline_mode = #tpu.pipeline_mode<synchronous>, transform_indices = @transform_5, window_bounds = array<i64: 1, 32>}, {pipeline_mode = #tpu.pipeline_mode<synchronous>, transform_indices = @transform_6, window_bounds = array<i64: 1, 32>}, {transform_indices = @transform_7, window_bounds = array<i64: 1, 8, 32>}]} {
    %c0_i32 = arith.constant 0 : i32
    %0 = arith.cmpi eq, %arg2, %c0_i32 : i32
    %1 = arith.extui %0 : i1 to i32
    %c0_i32_0 = arith.constant 0 : i32
    %2 = arith.cmpi ne, %1, %c0_i32_0 : i32
    scf.if %2 {
      %cst_111 = arith.constant 0xFF800000 : f32
      %164 = vector.broadcast %cst_111 : f32 to vector<4x8x1xf32>
      %c0_112 = arith.constant 0 : index
      %c0_113 = arith.constant 0 : index
      %c0_114 = arith.constant 0 : index
      %165 = vector.load %arg11[%c0_112, %c0_113, %c0_114] : memref<4x8x1xf32, #tpu.memory_space<vmem>>, vector<4x8x1xf32>
      tpu.vector_store %arg11[%c0_112, %c0_113, %c0_114], %164 {strides = array<i32>} : memref<4x8x1xf32, #tpu.memory_space<vmem>>, vector<4x8x1xf32>,
      %cst_115 = arith.constant 0.000000e+00 : f32
      %166 = vector.broadcast %cst_115 : f32 to vector<4x8x1xf32>
      %c0_116 = arith.constant 0 : index
      %c0_117 = arith.constant 0 : index
      %c0_118 = arith.constant 0 : index
      %167 = vector.load %arg12[%c0_116, %c0_117, %c0_118] : memref<4x8x1xf32, #tpu.memory_space<vmem>>, vector<4x8x1xf32>
      tpu.vector_store %arg12[%c0_116, %c0_117, %c0_118], %166 {strides = array<i32>} : memref<4x8x1xf32, #tpu.memory_space<vmem>>, vector<4x8x1xf32>,
      %cst_119 = arith.constant 0.000000e+00 : f32
      %168 = vector.broadcast %cst_119 : f32 to vector<4x8x8xf32>
      %c0_120 = arith.constant 0 : index
      %c0_121 = arith.constant 0 : index
      %c0_122 = arith.constant 0 : index
      %169 = vector.load %arg13[%c0_120, %c0_121, %c0_122] : memref<4x8x8xf32, #tpu.memory_space<vmem>>, vector<4x8x8xf32>
      tpu.vector_store %arg13[%c0_120, %c0_121, %c0_122], %168 {strides = array<i32>} : memref<4x8x8xf32, #tpu.memory_space<vmem>>, vector<4x8x8xf32>,
    } else {
    }
    %c0 = arith.constant 0 : index
    %c0_1 = arith.constant 0 : index
    %c0_2 = arith.constant 0 : index
    %3 = vector.load %arg3[%c0, %c0_1, %c0_2] : memref<1x8x32xf32, #tpu.memory_space<vmem>>, vector<1x8x32xf32>
    %4 = vector.shape_cast %3 : vector<1x8x32xf32> to vector<8x32xf32>
    %c0_3 = arith.constant 0 : index
    %c0_4 = arith.constant 0 : index
    %c0_5 = arith.constant 0 : index
    %5 = vector.load %arg4[%c0_3, %c0_4, %c0_5] : memref<1x8x32xf32, #tpu.memory_space<vmem>>, vector<1x8x32xf32>
    %6 = vector.shape_cast %5 : vector<1x8x32xf32> to vector<8x32xf32>
    %c0_6 = arith.constant 0 : index
    %c0_7 = arith.constant 0 : index
    %c0_8 = arith.constant 0 : index
    %7 = vector.load %arg5[%c0_6, %c0_7, %c0_8] : memref<1x8x32xf32, #tpu.memory_space<vmem>>, vector<1x8x32xf32>
    %8 = vector.shape_cast %7 : vector<1x8x32xf32> to vector<8x32xf32>
    %9 = vector.extract_strided_slice %4 {offsets = [0, 0], sizes = [8, 8], strides = [1, 1]} : vector<8x32xf32> to vector<8x8xf32>
    %10 = vector.extract_strided_slice %6 {offsets = [0, 0], sizes = [8, 8], strides = [1, 1]} : vector<8x32xf32> to vector<8x8xf32>
    %11 = vector.extract_strided_slice %8 {offsets = [0, 0], sizes = [8, 8], strides = [1, 1]} : vector<8x32xf32> to vector<8x8xf32>
    %cst = arith.constant dense<0.000000e+00> : vector<8x8xf32>
    %12 = tpu.matmul %9, %10, %cst {dimension_numbers = #tpu.dot_dimension_numbers<[1], [1], [0], [0], [0, 0, 1, 0], [], []>} : vector<8x8xf32>, vector<8x8xf32>, vector<8x8xf32> -> vector<8x8xf32>
    %c0_9 = arith.constant 0 : index
    %c0_10 = arith.constant 0 : index
    %c0_11 = arith.constant 0 : index
    %c0_12 = arith.constant 0 : index
    %13 = vector.load %arg6[%c0_9, %c0_10, %c0_11, %c0_12] : memref<1x4x8x8xf32, #tpu.memory_space<vmem>>, vector<1x1x8x8xf32>
    %14 = vector.shape_cast %13 : vector<1x1x8x8xf32> to vector<8x8xf32>
    %15 = arith.addf %12, %14 : vector<8x8xf32>
    %c0_13 = arith.constant 0 : index
    %c0_14 = arith.constant 0 : index
    %c0_15 = arith.constant 0 : index
    %16 = vector.load %arg11[%c0_13, %c0_14, %c0_15] : memref<4x8x1xf32, #tpu.memory_space<vmem>>, vector<1x8x1xf32>
    %17 = vector.shape_cast %16 : vector<1x8x1xf32> to vector<8x1xf32>
    %c0_16 = arith.constant 0 : index
    %c0_17 = arith.constant 0 : index
    %c0_18 = arith.constant 0 : index
    %18 = vector.load %arg12[%c0_16, %c0_17, %c0_18] : memref<4x8x1xf32, #tpu.memory_space<vmem>>, vector<1x8x1xf32>
    %19 = vector.shape_cast %18 : vector<1x8x1xf32> to vector<8x1xf32>
    %cst_19 = arith.constant dense<0xFF800000> : vector<8xf32>
    %20 = vector.multi_reduction <maximumf>, %15, %cst_19 [1] : vector<8x8xf32> to vector<8xf32>
    %21 = vector.shape_cast %20 : vector<8xf32> to vector<8x1xf32>
    %22 = arith.maximumf %17, %21 : vector<8x1xf32>
    %23 = arith.subf %17, %22 : vector<8x1xf32>
    %24 = math.exp %23 : vector<8x1xf32>
    %25 = vector.broadcast %22 : vector<8x1xf32> to vector<8x8xf32>
    %26 = arith.subf %15, %25 : vector<8x8xf32>
    %27 = math.exp %26 : vector<8x8xf32>
    %28 = arith.mulf %24, %19 : vector<8x1xf32>
    %cst_20 = arith.constant dense<0.000000e+00> : vector<8xf32>
    %29 = vector.multi_reduction <add>, %27, %cst_20 [1] : vector<8x8xf32> to vector<8xf32>
    %30 = vector.shape_cast %29 : vector<8xf32> to vector<8x1xf32>
    %31 = arith.addf %28, %30 : vector<8x1xf32>
    %c0_21 = arith.constant 0 : index
    %c0_22 = arith.constant 0 : index
    %c0_23 = arith.constant 0 : index
    %32 = vector.load %arg12[%c0_21, %c0_22, %c0_23] : memref<4x8x1xf32, #tpu.memory_space<vmem>>, vector<1x8x1xf32>
    %33 = vector.shape_cast %32 : vector<1x8x1xf32> to vector<8x1xf32>
    %34 = vector.shape_cast %31 : vector<8x1xf32> to vector<1x8x1xf32>
    tpu.vector_store %arg12[%c0_21, %c0_22, %c0_23], %34 {strides = array<i32>} : memref<4x8x1xf32, #tpu.memory_space<vmem>>, vector<1x8x1xf32>,
    %c0_24 = arith.constant 0 : index
    %c0_25 = arith.constant 0 : index
    %c0_26 = arith.constant 0 : index
    %35 = vector.load %arg13[%c0_24, %c0_25, %c0_26] : memref<4x8x8xf32, #tpu.memory_space<vmem>>, vector<1x8x8xf32>
    %36 = vector.shape_cast %35 : vector<1x8x8xf32> to vector<8x8xf32>
    %37 = vector.broadcast %24 : vector<8x1xf32> to vector<8x8xf32>
    %38 = arith.mulf %37, %36 : vector<8x8xf32>
    %cst_27 = arith.constant dense<0.000000e+00> : vector<8x8xf32>
    %39 = tpu.matmul %27, %11, %cst_27 {dimension_numbers = #tpu.dot_dimension_numbers<[1], [0], [0], [1], [0, 0, 1, 1], [], []>} : vector<8x8xf32>, vector<8x8xf32>, vector<8x8xf32> -> vector<8x8xf32>
    %40 = arith.addf %38, %39 : vector<8x8xf32>
    %c0_28 = arith.constant 0 : index
    %c0_29 = arith.constant 0 : index
    %c0_30 = arith.constant 0 : index
    %41 = vector.load %arg13[%c0_28, %c0_29, %c0_30] : memref<4x8x8xf32, #tpu.memory_space<vmem>>, vector<1x8x8xf32>
    %42 = vector.shape_cast %41 : vector<1x8x8xf32> to vector<8x8xf32>
    %43 = vector.shape_cast %40 : vector<8x8xf32> to vector<1x8x8xf32>
    tpu.vector_store %arg13[%c0_28, %c0_29, %c0_30], %43 {strides = array<i32>} : memref<4x8x8xf32, #tpu.memory_space<vmem>>, vector<1x8x8xf32>,
    %c0_31 = arith.constant 0 : index
    %c0_32 = arith.constant 0 : index
    %c0_33 = arith.constant 0 : index
    %44 = vector.load %arg11[%c0_31, %c0_32, %c0_33] : memref<4x8x1xf32, #tpu.memory_space<vmem>>, vector<1x8x1xf32>
    %45 = vector.shape_cast %44 : vector<1x8x1xf32> to vector<8x1xf32>
    %46 = vector.shape_cast %22 : vector<8x1xf32> to vector<1x8x1xf32>
    tpu.vector_store %arg11[%c0_31, %c0_32, %c0_33], %46 {strides = array<i32>} : memref<4x8x1xf32, #tpu.memory_space<vmem>>, vector<1x8x1xf32>,
    %47 = vector.extract_strided_slice %4 {offsets = [0, 8], sizes = [8, 8], strides = [1, 1]} : vector<8x32xf32> to vector<8x8xf32>
    %48 = vector.extract_strided_slice %6 {offsets = [0, 8], sizes = [8, 8], strides = [1, 1]} : vector<8x32xf32> to vector<8x8xf32>
    %49 = vector.extract_strided_slice %8 {offsets = [0, 8], sizes = [8, 8], strides = [1, 1]} : vector<8x32xf32> to vector<8x8xf32>
    %cst_34 = arith.constant dense<0.000000e+00> : vector<8x8xf32>
    %50 = tpu.matmul %47, %48, %cst_34 {dimension_numbers = #tpu.dot_dimension_numbers<[1], [1], [0], [0], [0, 0, 1, 0], [], []>} : vector<8x8xf32>, vector<8x8xf32>, vector<8x8xf32> -> vector<8x8xf32>
    %c0_35 = arith.constant 0 : index
    %c1 = arith.constant 1 : index
    %c0_36 = arith.constant 0 : index
    %c0_37 = arith.constant 0 : index
    %51 = vector.load %arg6[%c0_35, %c1, %c0_36, %c0_37] : memref<1x4x8x8xf32, #tpu.memory_space<vmem>>, vector<1x1x8x8xf32>
    %52 = vector.shape_cast %51 : vector<1x1x8x8xf32> to vector<8x8xf32>
    %53 = arith.addf %50, %52 : vector<8x8xf32>
    %c1_38 = arith.constant 1 : index
    %c0_39 = arith.constant 0 : index
    %c0_40 = arith.constant 0 : index
    %54 = vector.load %arg11[%c1_38, %c0_39, %c0_40] : memref<4x8x1xf32, #tpu.memory_space<vmem>>, vector<1x8x1xf32>
    %55 = vector.shape_cast %54 : vector<1x8x1xf32> to vector<8x1xf32>
    %c1_41 = arith.constant 1 : index
    %c0_42 = arith.constant 0 : index
    %c0_43 = arith.constant 0 : index
    %56 = vector.load %arg12[%c1_41, %c0_42, %c0_43] : memref<4x8x1xf32, #tpu.memory_space<vmem>>, vector<1x8x1xf32>
    %57 = vector.shape_cast %56 : vector<1x8x1xf32> to vector<8x1xf32>
    %cst_44 = arith.constant dense<0xFF800000> : vector<8xf32>
    %58 = vector.multi_reduction <maximumf>, %53, %cst_44 [1] : vector<8x8xf32> to vector<8xf32>
    %59 = vector.shape_cast %58 : vector<8xf32> to vector<8x1xf32>
    %60 = arith.maximumf %55, %59 : vector<8x1xf32>
    %61 = arith.subf %55, %60 : vector<8x1xf32>
    %62 = math.exp %61 : vector<8x1xf32>
    %63 = vector.broadcast %60 : vector<8x1xf32> to vector<8x8xf32>
    %64 = arith.subf %53, %63 : vector<8x8xf32>
    %65 = math.exp %64 : vector<8x8xf32>
    %66 = arith.mulf %62, %57 : vector<8x1xf32>
    %cst_45 = arith.constant dense<0.000000e+00> : vector<8xf32>
    %67 = vector.multi_reduction <add>, %65, %cst_45 [1] : vector<8x8xf32> to vector<8xf32>
    %68 = vector.shape_cast %67 : vector<8xf32> to vector<8x1xf32>
    %69 = arith.addf %66, %68 : vector<8x1xf32>
    %c1_46 = arith.constant 1 : index
    %c0_47 = arith.constant 0 : index
    %c0_48 = arith.constant 0 : index
    %70 = vector.load %arg12[%c1_46, %c0_47, %c0_48] : memref<4x8x1xf32, #tpu.memory_space<vmem>>, vector<1x8x1xf32>
    %71 = vector.shape_cast %70 : vector<1x8x1xf32> to vector<8x1xf32>
    %72 = vector.shape_cast %69 : vector<8x1xf32> to vector<1x8x1xf32>
    tpu.vector_store %arg12[%c1_46, %c0_47, %c0_48], %72 {strides = array<i32>} : memref<4x8x1xf32, #tpu.memory_space<vmem>>, vector<1x8x1xf32>,
    %c1_49 = arith.constant 1 : index
    %c0_50 = arith.constant 0 : index
    %c0_51 = arith.constant 0 : index
    %73 = vector.load %arg13[%c1_49, %c0_50, %c0_51] : memref<4x8x8xf32, #tpu.memory_space<vmem>>, vector<1x8x8xf32>
    %74 = vector.shape_cast %73 : vector<1x8x8xf32> to vector<8x8xf32>
    %75 = vector.broadcast %62 : vector<8x1xf32> to vector<8x8xf32>
    %76 = arith.mulf %75, %74 : vector<8x8xf32>
    %cst_52 = arith.constant dense<0.000000e+00> : vector<8x8xf32>
    %77 = tpu.matmul %65, %49, %cst_52 {dimension_numbers = #tpu.dot_dimension_numbers<[1], [0], [0], [1], [0, 0, 1, 1], [], []>} : vector<8x8xf32>, vector<8x8xf32>, vector<8x8xf32> -> vector<8x8xf32>
    %78 = arith.addf %76, %77 : vector<8x8xf32>
    %c1_53 = arith.constant 1 : index
    %c0_54 = arith.constant 0 : index
    %c0_55 = arith.constant 0 : index
    %79 = vector.load %arg13[%c1_53, %c0_54, %c0_55] : memref<4x8x8xf32, #tpu.memory_space<vmem>>, vector<1x8x8xf32>
    %80 = vector.shape_cast %79 : vector<1x8x8xf32> to vector<8x8xf32>
    %81 = vector.shape_cast %78 : vector<8x8xf32> to vector<1x8x8xf32>
    tpu.vector_store %arg13[%c1_53, %c0_54, %c0_55], %81 {strides = array<i32>} : memref<4x8x8xf32, #tpu.memory_space<vmem>>, vector<1x8x8xf32>,
    %c1_56 = arith.constant 1 : index
    %c0_57 = arith.constant 0 : index
    %c0_58 = arith.constant 0 : index
    %82 = vector.load %arg11[%c1_56, %c0_57, %c0_58] : memref<4x8x1xf32, #tpu.memory_space<vmem>>, vector<1x8x1xf32>
    %83 = vector.shape_cast %82 : vector<1x8x1xf32> to vector<8x1xf32>
    %84 = vector.shape_cast %60 : vector<8x1xf32> to vector<1x8x1xf32>
    tpu.vector_store %arg11[%c1_56, %c0_57, %c0_58], %84 {strides = array<i32>} : memref<4x8x1xf32, #tpu.memory_space<vmem>>, vector<1x8x1xf32>,
    %85 = vector.extract_strided_slice %4 {offsets = [0, 16], sizes = [8, 8], strides = [1, 1]} : vector<8x32xf32> to vector<8x8xf32>
    %86 = vector.extract_strided_slice %6 {offsets = [0, 16], sizes = [8, 8], strides = [1, 1]} : vector<8x32xf32> to vector<8x8xf32>
    %87 = vector.extract_strided_slice %8 {offsets = [0, 16], sizes = [8, 8], strides = [1, 1]} : vector<8x32xf32> to vector<8x8xf32>
    %cst_59 = arith.constant dense<0.000000e+00> : vector<8x8xf32>
    %88 = tpu.matmul %85, %86, %cst_59 {dimension_numbers = #tpu.dot_dimension_numbers<[1], [1], [0], [0], [0, 0, 1, 0], [], []>} : vector<8x8xf32>, vector<8x8xf32>, vector<8x8xf32> -> vector<8x8xf32>
    %c0_60 = arith.constant 0 : index
    %c2 = arith.constant 2 : index
    %c0_61 = arith.constant 0 : index
    %c0_62 = arith.constant 0 : index
    %89 = vector.load %arg6[%c0_60, %c2, %c0_61, %c0_62] : memref<1x4x8x8xf32, #tpu.memory_space<vmem>>, vector<1x1x8x8xf32>
    %90 = vector.shape_cast %89 : vector<1x1x8x8xf32> to vector<8x8xf32>
    %91 = arith.addf %88, %90 : vector<8x8xf32>
    %c2_63 = arith.constant 2 : index
    %c0_64 = arith.constant 0 : index
    %c0_65 = arith.constant 0 : index
    %92 = vector.load %arg11[%c2_63, %c0_64, %c0_65] : memref<4x8x1xf32, #tpu.memory_space<vmem>>, vector<1x8x1xf32>
    %93 = vector.shape_cast %92 : vector<1x8x1xf32> to vector<8x1xf32>
    %c2_66 = arith.constant 2 : index
    %c0_67 = arith.constant 0 : index
    %c0_68 = arith.constant 0 : index
    %94 = vector.load %arg12[%c2_66, %c0_67, %c0_68] : memref<4x8x1xf32, #tpu.memory_space<vmem>>, vector<1x8x1xf32>
    %95 = vector.shape_cast %94 : vector<1x8x1xf32> to vector<8x1xf32>
    %cst_69 = arith.constant dense<0xFF800000> : vector<8xf32>
    %96 = vector.multi_reduction <maximumf>, %91, %cst_69 [1] : vector<8x8xf32> to vector<8xf32>
    %97 = vector.shape_cast %96 : vector<8xf32> to vector<8x1xf32>
    %98 = arith.maximumf %93, %97 : vector<8x1xf32>
    %99 = arith.subf %93, %98 : vector<8x1xf32>
    %100 = math.exp %99 : vector<8x1xf32>
    %101 = vector.broadcast %98 : vector<8x1xf32> to vector<8x8xf32>
    %102 = arith.subf %91, %101 : vector<8x8xf32>
    %103 = math.exp %102 : vector<8x8xf32>
    %104 = arith.mulf %100, %95 : vector<8x1xf32>
    %cst_70 = arith.constant dense<0.000000e+00> : vector<8xf32>
    %105 = vector.multi_reduction <add>, %103, %cst_70 [1] : vector<8x8xf32> to vector<8xf32>
    %106 = vector.shape_cast %105 : vector<8xf32> to vector<8x1xf32>
    %107 = arith.addf %104, %106 : vector<8x1xf32>
    %c2_71 = arith.constant 2 : index
    %c0_72 = arith.constant 0 : index
    %c0_73 = arith.constant 0 : index
    %108 = vector.load %arg12[%c2_71, %c0_72, %c0_73] : memref<4x8x1xf32, #tpu.memory_space<vmem>>, vector<1x8x1xf32>
    %109 = vector.shape_cast %108 : vector<1x8x1xf32> to vector<8x1xf32>
    %110 = vector.shape_cast %107 : vector<8x1xf32> to vector<1x8x1xf32>
    tpu.vector_store %arg12[%c2_71, %c0_72, %c0_73], %110 {strides = array<i32>} : memref<4x8x1xf32, #tpu.memory_space<vmem>>, vector<1x8x1xf32>,
    %c2_74 = arith.constant 2 : index
    %c0_75 = arith.constant 0 : index
    %c0_76 = arith.constant 0 : index
    %111 = vector.load %arg13[%c2_74, %c0_75, %c0_76] : memref<4x8x8xf32, #tpu.memory_space<vmem>>, vector<1x8x8xf32>
    %112 = vector.shape_cast %111 : vector<1x8x8xf32> to vector<8x8xf32>
    %113 = vector.broadcast %100 : vector<8x1xf32> to vector<8x8xf32>
    %114 = arith.mulf %113, %112 : vector<8x8xf32>
    %cst_77 = arith.constant dense<0.000000e+00> : vector<8x8xf32>
    %115 = tpu.matmul %103, %87, %cst_77 {dimension_numbers = #tpu.dot_dimension_numbers<[1], [0], [0], [1], [0, 0, 1, 1], [], []>} : vector<8x8xf32>, vector<8x8xf32>, vector<8x8xf32> -> vector<8x8xf32>
    %116 = arith.addf %114, %115 : vector<8x8xf32>
    %c2_78 = arith.constant 2 : index
    %c0_79 = arith.constant 0 : index
    %c0_80 = arith.constant 0 : index
    %117 = vector.load %arg13[%c2_78, %c0_79, %c0_80] : memref<4x8x8xf32, #tpu.memory_space<vmem>>, vector<1x8x8xf32>
    %118 = vector.shape_cast %117 : vector<1x8x8xf32> to vector<8x8xf32>
    %119 = vector.shape_cast %116 : vector<8x8xf32> to vector<1x8x8xf32>
    tpu.vector_store %arg13[%c2_78, %c0_79, %c0_80], %119 {strides = array<i32>} : memref<4x8x8xf32, #tpu.memory_space<vmem>>, vector<1x8x8xf32>,
    %c2_81 = arith.constant 2 : index
    %c0_82 = arith.constant 0 : index
    %c0_83 = arith.constant 0 : index
    %120 = vector.load %arg11[%c2_81, %c0_82, %c0_83] : memref<4x8x1xf32, #tpu.memory_space<vmem>>, vector<1x8x1xf32>
    %121 = vector.shape_cast %120 : vector<1x8x1xf32> to vector<8x1xf32>
    %122 = vector.shape_cast %98 : vector<8x1xf32> to vector<1x8x1xf32>
    tpu.vector_store %arg11[%c2_81, %c0_82, %c0_83], %122 {strides = array<i32>} : memref<4x8x1xf32, #tpu.memory_space<vmem>>, vector<1x8x1xf32>,
    %123 = vector.extract_strided_slice %4 {offsets = [0, 24], sizes = [8, 8], strides = [1, 1]} : vector<8x32xf32> to vector<8x8xf32>
    %124 = vector.extract_strided_slice %6 {offsets = [0, 24], sizes = [8, 8], strides = [1, 1]} : vector<8x32xf32> to vector<8x8xf32>
    %125 = vector.extract_strided_slice %8 {offsets = [0, 24], sizes = [8, 8], strides = [1, 1]} : vector<8x32xf32> to vector<8x8xf32>
    %cst_84 = arith.constant dense<0.000000e+00> : vector<8x8xf32>
    %126 = tpu.matmul %123, %124, %cst_84 {dimension_numbers = #tpu.dot_dimension_numbers<[1], [1], [0], [0], [0, 0, 1, 0], [], []>} : vector<8x8xf32>, vector<8x8xf32>, vector<8x8xf32> -> vector<8x8xf32>
    %c0_85 = arith.constant 0 : index
    %c3 = arith.constant 3 : index
    %c0_86 = arith.constant 0 : index
    %c0_87 = arith.constant 0 : index
    %127 = vector.load %arg6[%c0_85, %c3, %c0_86, %c0_87] : memref<1x4x8x8xf32, #tpu.memory_space<vmem>>, vector<1x1x8x8xf32>
    %128 = vector.shape_cast %127 : vector<1x1x8x8xf32> to vector<8x8xf32>
    %129 = arith.addf %126, %128 : vector<8x8xf32>
    %c3_88 = arith.constant 3 : index
    %c0_89 = arith.constant 0 : index
    %c0_90 = arith.constant 0 : index
    %130 = vector.load %arg11[%c3_88, %c0_89, %c0_90] : memref<4x8x1xf32, #tpu.memory_space<vmem>>, vector<1x8x1xf32>
    %131 = vector.shape_cast %130 : vector<1x8x1xf32> to vector<8x1xf32>
    %c3_91 = arith.constant 3 : index
    %c0_92 = arith.constant 0 : index
    %c0_93 = arith.constant 0 : index
    %132 = vector.load %arg12[%c3_91, %c0_92, %c0_93] : memref<4x8x1xf32, #tpu.memory_space<vmem>>, vector<1x8x1xf32>
    %133 = vector.shape_cast %132 : vector<1x8x1xf32> to vector<8x1xf32>
    %cst_94 = arith.constant dense<0xFF800000> : vector<8xf32>
    %134 = vector.multi_reduction <maximumf>, %129, %cst_94 [1] : vector<8x8xf32> to vector<8xf32>
    %135 = vector.shape_cast %134 : vector<8xf32> to vector<8x1xf32>
    %136 = arith.maximumf %131, %135 : vector<8x1xf32>
    %137 = arith.subf %131, %136 : vector<8x1xf32>
    %138 = math.exp %137 : vector<8x1xf32>
    %139 = vector.broadcast %136 : vector<8x1xf32> to vector<8x8xf32>
    %140 = arith.subf %129, %139 : vector<8x8xf32>
    %141 = math.exp %140 : vector<8x8xf32>
    %142 = arith.mulf %138, %133 : vector<8x1xf32>
    %cst_95 = arith.constant dense<0.000000e+00> : vector<8xf32>
    %143 = vector.multi_reduction <add>, %141, %cst_95 [1] : vector<8x8xf32> to vector<8xf32>
    %144 = vector.shape_cast %143 : vector<8xf32> to vector<8x1xf32>
    %145 = arith.addf %142, %144 : vector<8x1xf32>
    %c3_96 = arith.constant 3 : index
    %c0_97 = arith.constant 0 : index
    %c0_98 = arith.constant 0 : index
    %146 = vector.load %arg12[%c3_96, %c0_97, %c0_98] : memref<4x8x1xf32, #tpu.memory_space<vmem>>, vector<1x8x1xf32>
    %147 = vector.shape_cast %146 : vector<1x8x1xf32> to vector<8x1xf32>
    %148 = vector.shape_cast %145 : vector<8x1xf32> to vector<1x8x1xf32>
    tpu.vector_store %arg12[%c3_96, %c0_97, %c0_98], %148 {strides = array<i32>} : memref<4x8x1xf32, #tpu.memory_space<vmem>>, vector<1x8x1xf32>,
    %c3_99 = arith.constant 3 : index
    %c0_100 = arith.constant 0 : index
    %c0_101 = arith.constant 0 : index
    %149 = vector.load %arg13[%c3_99, %c0_100, %c0_101] : memref<4x8x8xf32, #tpu.memory_space<vmem>>, vector<1x8x8xf32>
    %150 = vector.shape_cast %149 : vector<1x8x8xf32> to vector<8x8xf32>
    %151 = vector.broadcast %138 : vector<8x1xf32> to vector<8x8xf32>
    %152 = arith.mulf %151, %150 : vector<8x8xf32>
    %cst_102 = arith.constant dense<0.000000e+00> : vector<8x8xf32>
    %153 = tpu.matmul %141, %125, %cst_102 {dimension_numbers = #tpu.dot_dimension_numbers<[1], [0], [0], [1], [0, 0, 1, 1], [], []>} : vector<8x8xf32>, vector<8x8xf32>, vector<8x8xf32> -> vector<8x8xf32>
    %154 = arith.addf %152, %153 : vector<8x8xf32>
    %c3_103 = arith.constant 3 : index
    %c0_104 = arith.constant 0 : index
    %c0_105 = arith.constant 0 : index
    %155 = vector.load %arg13[%c3_103, %c0_104, %c0_105] : memref<4x8x8xf32, #tpu.memory_space<vmem>>, vector<1x8x8xf32>
    %156 = vector.shape_cast %155 : vector<1x8x8xf32> to vector<8x8xf32>
    %157 = vector.shape_cast %154 : vector<8x8xf32> to vector<1x8x8xf32>
    tpu.vector_store %arg13[%c3_103, %c0_104, %c0_105], %157 {strides = array<i32>} : memref<4x8x8xf32, #tpu.memory_space<vmem>>, vector<1x8x8xf32>,
    %c3_106 = arith.constant 3 : index
    %c0_107 = arith.constant 0 : index
    %c0_108 = arith.constant 0 : index
    %158 = vector.load %arg11[%c3_106, %c0_107, %c0_108] : memref<4x8x1xf32, #tpu.memory_space<vmem>>, vector<1x8x1xf32>
    %159 = vector.shape_cast %158 : vector<1x8x1xf32> to vector<8x1xf32>
    %160 = vector.shape_cast %136 : vector<8x1xf32> to vector<1x8x1xf32>
    tpu.vector_store %arg11[%c3_106, %c0_107, %c0_108], %160 {strides = array<i32>} : memref<4x8x1xf32, #tpu.memory_space<vmem>>, vector<1x8x1xf32>,
    %c0_i32_109 = arith.constant 0 : i32
    %161 = arith.cmpi eq, %arg2, %c0_i32_109 : i32
    %162 = arith.extui %161 : i1 to i32
    %c0_i32_110 = arith.constant 0 : i32
    %163 = arith.cmpi ne, %162, %c0_i32_110 : i32
    scf.if %163 {
      %c0_111 = arith.constant 0 : index
      %c0_112 = arith.constant 0 : index
      %c0_113 = arith.constant 0 : index
      %164 = vector.load %arg13[%c0_111, %c0_112, %c0_113] : memref<4x8x8xf32, #tpu.memory_space<vmem>>, vector<1x8x8xf32>
      %165 = vector.shape_cast %164 : vector<1x8x8xf32> to vector<8x8xf32>
      %c0_114 = arith.constant 0 : index
      %c0_115 = arith.constant 0 : index
      %c0_116 = arith.constant 0 : index
      %166 = vector.load %arg12[%c0_114, %c0_115, %c0_116] : memref<4x8x1xf32, #tpu.memory_space<vmem>>, vector<1x8x1xf32>
      %167 = vector.shape_cast %166 : vector<1x8x1xf32> to vector<8x1xf32>
      %168 = vector.broadcast %167 : vector<8x1xf32> to vector<8x8xf32>
      %169 = arith.divf %165, %168 : vector<8x8xf32>
      %c1_117 = arith.constant 1 : index
      %c0_118 = arith.constant 0 : index
      %c0_119 = arith.constant 0 : index
      %170 = vector.load %arg13[%c1_117, %c0_118, %c0_119] : memref<4x8x8xf32, #tpu.memory_space<vmem>>, vector<1x8x8xf32>
      %171 = vector.shape_cast %170 : vector<1x8x8xf32> to vector<8x8xf32>
      %c1_120 = arith.constant 1 : index
      %c0_121 = arith.constant 0 : index
      %c0_122 = arith.constant 0 : index
      %172 = vector.load %arg12[%c1_120, %c0_121, %c0_122] : memref<4x8x1xf32, #tpu.memory_space<vmem>>, vector<1x8x1xf32>
      %173 = vector.shape_cast %172 : vector<1x8x1xf32> to vector<8x1xf32>
      %174 = vector.broadcast %173 : vector<8x1xf32> to vector<8x8xf32>
      %175 = arith.divf %171, %174 : vector<8x8xf32>
      %c2_123 = arith.constant 2 : index
      %c0_124 = arith.constant 0 : index
      %c0_125 = arith.constant 0 : index
      %176 = vector.load %arg13[%c2_123, %c0_124, %c0_125] : memref<4x8x8xf32, #tpu.memory_space<vmem>>, vector<1x8x8xf32>
      %177 = vector.shape_cast %176 : vector<1x8x8xf32> to vector<8x8xf32>
      %c2_126 = arith.constant 2 : index
      %c0_127 = arith.constant 0 : index
      %c0_128 = arith.constant 0 : index
      %178 = vector.load %arg12[%c2_126, %c0_127, %c0_128] : memref<4x8x1xf32, #tpu.memory_space<vmem>>, vector<1x8x1xf32>
      %179 = vector.shape_cast %178 : vector<1x8x1xf32> to vector<8x1xf32>
      %180 = vector.broadcast %179 : vector<8x1xf32> to vector<8x8xf32>
      %181 = arith.divf %177, %180 : vector<8x8xf32>
      %c3_129 = arith.constant 3 : index
      %c0_130 = arith.constant 0 : index
      %c0_131 = arith.constant 0 : index
      %182 = vector.load %arg13[%c3_129, %c0_130, %c0_131] : memref<4x8x8xf32, #tpu.memory_space<vmem>>, vector<1x8x8xf32>
      %183 = vector.shape_cast %182 : vector<1x8x8xf32> to vector<8x8xf32>
      %c3_132 = arith.constant 3 : index
      %c0_133 = arith.constant 0 : index
      %c0_134 = arith.constant 0 : index
      %184 = vector.load %arg12[%c3_132, %c0_133, %c0_134] : memref<4x8x1xf32, #tpu.memory_space<vmem>>, vector<1x8x1xf32>
      %185 = vector.shape_cast %184 : vector<1x8x1xf32> to vector<8x1xf32>
      %186 = vector.broadcast %185 : vector<8x1xf32> to vector<8x8xf32>
      %187 = arith.divf %183, %186 : vector<8x8xf32>
      %188 = tpu.concatenate %169, %175, %181, %187 in 1 : vector<8x8xf32>, vector<8x8xf32>, vector<8x8xf32>, vector<8x8xf32> -> vector<8x32xf32>
      %cst_135 = arith.constant dense<0.000000e+00> : vector<8xf32>
      %189 = vector.multi_reduction <add>, %188, %cst_135 [1] : vector<8x32xf32> to vector<8xf32>
      %190 = vector.shape_cast %189 : vector<8xf32> to vector<8x1xf32>
      %cst_136 = arith.constant 3.200000e+01 : f32
      %191 = vector.broadcast %cst_136 : f32 to vector<8x1xf32>
      %192 = arith.divf %190, %191 : vector<8x1xf32>
      %193 = vector.broadcast %192 : vector<8x1xf32> to vector<8x32xf32>
      %194 = arith.subf %188, %193 : vector<8x32xf32>
      %195 = arith.mulf %194, %194 : vector<8x32xf32>
      %cst_137 = arith.constant dense<0.000000e+00> : vector<8xf32>
      %196 = vector.multi_reduction <add>, %195, %cst_137 [1] : vector<8x32xf32> to vector<8xf32>
      %197 = vector.shape_cast %196 : vector<8xf32> to vector<8x1xf32>
      %cst_138 = arith.constant 3.200000e+01 : f32
      %198 = vector.broadcast %cst_138 : f32 to vector<8x1xf32>
      %199 = arith.divf %197, %198 : vector<8x1xf32>
      %200 = vector.broadcast %192 : vector<8x1xf32> to vector<8x32xf32>
      %201 = arith.subf %188, %200 : vector<8x32xf32>
      %cst_139 = arith.constant 9.99999974E-6 : f32
      %202 = vector.broadcast %cst_139 : f32 to vector<8x1xf32>
      %203 = arith.addf %199, %202 : vector<8x1xf32>
      %204 = math.rsqrt %203 : vector<8x1xf32>
      %205 = vector.broadcast %204 : vector<8x1xf32> to vector<8x32xf32>
      %206 = arith.mulf %201, %205 : vector<8x32xf32>
      %c0_140 = arith.constant 0 : index
      %c0_141 = arith.constant 0 : index
      %207 = vector.load %arg8[%c0_140, %c0_141] : memref<1x32xf32, #tpu.memory_space<vmem>>, vector<1x32xf32>
      %208 = vector.broadcast %207 : vector<1x32xf32> to vector<8x32xf32>
      %209 = arith.mulf %206, %208 : vector<8x32xf32>
      %c0_142 = arith.constant 0 : index
      %c0_143 = arith.constant 0 : index
      %210 = vector.load %arg9[%c0_142, %c0_143] : memref<1x32xf32, #tpu.memory_space<vmem>>, vector<1x32xf32>
      %211 = vector.broadcast %210 : vector<1x32xf32> to vector<8x32xf32>
      %212 = arith.addf %209, %211 : vector<8x32xf32>
      %c0_144 = arith.constant 0 : index
      %c0_145 = arith.constant 0 : index
      %213 = vector.load %arg7[%c0_144, %c0_145] : memref<32x32xf32, #tpu.memory_space<vmem>>, vector<32x32xf32>
      %cst_146 = arith.constant dense<0.000000e+00> : vector<8x32xf32>
      %214 = tpu.matmul %212, %213, %cst_146 {dimension_numbers = #tpu.dot_dimension_numbers<[1], [0], [0], [1], [0, 0, 1, 1], [], []>} : vector<8x32xf32>, vector<32x32xf32>, vector<8x32xf32> -> vector<8x32xf32>
      %c0_147 = arith.constant 0 : index
      %c0_148 = arith.constant 0 : index
      %c0_149 = arith.constant 0 : index
      %215 = vector.load %arg10[%c0_147, %c0_148, %c0_149] : memref<1x8x32xf32, #tpu.memory_space<vmem>>, vector<1x8x32xf32>
      %216 = vector.shape_cast %215 : vector<1x8x32xf32> to vector<8x32xf32>
      %217 = vector.shape_cast %214 : vector<8x32xf32> to vector<1x8x32xf32>
      tpu.vector_store %arg10[%c0_147, %c0_148, %c0_149], %217 {strides = array<i32>} : memref<1x8x32xf32, #tpu.memory_space<vmem>>, vector<1x8x32xf32>,
    } else {
    }
    return
  }
  func.func @transform_0(%arg0: i32, %arg1: i32, %arg2: i32) -> (i32, i32, i32) {
    %c0_i32 = arith.constant 0 : i32
    %c0_i32_0 = arith.constant 0 : i32
    return %arg0, %arg1, %c0_i32 : i32, i32, i32
  }
  func.func @transform_1(%arg0: i32, %arg1: i32, %arg2: i32) -> (i32, i32, i32) {
    %c0_i32 = arith.constant 0 : i32
    %c0_i32_0 = arith.constant 0 : i32
    return %arg0, %arg2, %c0_i32 : i32, i32, i32
  }
  func.func @transform_2(%arg0: i32, %arg1: i32, %arg2: i32) -> (i32, i32, i32) {
    %c0_i32 = arith.constant 0 : i32
    %c0_i32_0 = arith.constant 0 : i32
    return %arg0, %arg2, %c0_i32 : i32, i32, i32
  }
  func.func @transform_3(%arg0: i32, %arg1: i32, %arg2: i32) -> (i32, i32, i32, i32) {
    %c0_i32 = arith.constant 0 : i32
    %c0_i32_0 = arith.constant 0 : i32
    return %arg0, %c0_i32, %arg1, %arg2 : i32, i32, i32, i32
  }
  func.func @transform_4(%arg0: i32, %arg1: i32, %arg2: i32) -> (i32, i32) {
    %c0_i32 = arith.constant 0 : i32
    %c0_i32_0 = arith.constant 0 : i32
    %c0_i32_1 = arith.constant 0 : i32
    return %c0_i32, %c0_i32_0 : i32, i32
  }
  func.func @transform_5(%arg0: i32, %arg1: i32, %arg2: i32) -> (i32, i32) {
    %c0_i32 = arith.constant 0 : i32
    %c0_i32_0 = arith.constant 0 : i32
    %c0_i32_1 = arith.constant 0 : i32
    return %c0_i32, %c0_i32_0 : i32, i32
  }
  func.func @transform_6(%arg0: i32, %arg1: i32, %arg2: i32) -> (i32, i32) {
    %c0_i32 = arith.constant 0 : i32
    %c0_i32_0 = arith.constant 0 : i32
    %c0_i32_1 = arith.constant 0 : i32
    return %c0_i32, %c0_i32_0 : i32, i32
  }
  func.func @transform_7(%arg0: i32, %arg1: i32, %arg2: i32) -> (i32, i32, i32) {
    %c0_i32 = arith.constant 0 : i32
    %c0_i32_0 = arith.constant 0 : i32
    return %arg0, %arg1, %c0_i32 : i32, i32, i32
  }
}

</mosaic_0001>

<bundles_post_ra>
// kernel: tpu_custom_call.1
= control target key start
LH: loop header
LB: loop body
LE: loop exit
PB: predicated region body
PF: predicated region fallthrough
CT: control target
= control target key end

     0   :  { %s2598_s0 = inlined_call_operand.hbm [shape: f32[2,8,32], index: 0, kind: input, shape index: {}]   ;;  %s2599_s1 = inlined_call_operand.hbm [shape: f32[2,8,32], index: 1, kind: input, shape index: {}]   ;;  %s2600_s2 = inlined_call_operand.hbm [shape: f32[2,8,32], index: 2, kind: input, shape index: {}]   ;;  %s2601_s3 = inlined_call_operand.hbm [shape: f32[2,4,8,8], index: 3, kind: input, shape index: {}]   ;;  %s2602_s4 = inlined_call_operand.hbm [shape: f32[32,32], index: 4, kind: input, shape index: {}]   ;;  %s2603_s5 = inlined_call_operand.vmem [shape: f32[1,32], index: 5, kind: input, shape index: {}]   ;;  %s2604_s6 = inlined_call_operand.vmem [shape: f32[1,32], index: 6, kind: input, shape index: {}]   ;;  %s2605_s7 = inlined_call_operand.hbm [shape: f32[2,8,32], index: 7, kind: output, shape index: {}]  }
   0x1   :  { %2622 = sst [smem:[#allocation26_spill]] %s2599_s1 }
   0x2   :  { %2623 = sst [smem:[#allocation27_spill]] %s2602_s4 }
   0x3   :  { %2624 = sst [smem:[#allocation28_spill]] %s2604_s6 }
   0x4   :  { %2625 = sst [smem:[#allocation29_spill]] %s2605_s7 }
   0x5   :  { %12 = vsyncpa [#allocation6], 0 }
   0x6   :  { %14 = vsyncpa [#allocation6 + $0x1], 0 }
   0x7   :  { %15 = vsyncpa [#allocation9], 0 }
   0x8   :  { %17 = vsyncpa [#allocation9 + $0x1], 0 }
   0x9   :  { %18 = vsyncpa [#allocation12], 0 }
   0xa   :  { %20 = vsyncpa [#allocation12 + $0x1], 0 }
   0xb   :  { %21 = vsyncpa [#allocation7], 0 }
   0xc   :  { %23 = vsyncpa [#allocation7 + $0x1], 0  ;;  %s2135_s24 = smov 0   ;;  %s2137_s25 = smov 0  }
   0xd   :  { %s2139_s26 = smov 0   ;;  %s2141_s27 = smov 0  }
   0xe   :  { %s2143_s28 = smov 0   ;;  %s2145_s29 = smov 0  }
   0xf LB: > { %2626 = sst [smem:[#allocation20_spill]] %s2054_s24  ;;  %s2166_s30 = sadd.s32 4294967295, %s2074_s29   ;;  %s2074_s29 = sphi %s2145_s29, %s29_s29   ;;  %s2070_s28 = sphi %s2143_s28, %s2665_s28   ;;  %s2066_s27 = sphi %s2141_s27, %s2664_s27   ;;  %s2062_s26 = sphi %s2139_s26, %s2660_s26   ;;  %s2058_s25 = sphi %s2137_s25, %s2663_s25   ;;  %s2054_s24 = sphi %s2135_s24, %s2662_s24  }
  0x10   : > { %2627 = sst [smem:[#allocation21_spill]] %s2062_s26  ;;  %s1582_s8 = sadd.s32 4294967294, %s2074_s29  }
  0x11   : > { %p70_p0 = scmp.ne.s32.totalorder %s2058_s25, %s2054_s24  ;;  %p2606_p1 = scmp.eq.s32.totalorder %s2166_s30, 0 }
  0x12   : > { %p251_p3 = scmp.eq.s32.totalorder %s1582_s8, 1  ;;  %p1583_p5 = scmp.ge.s32.totalorder %s2074_s29, 1 }
  0x13   : > { %p2175_p4 = por %p2606_p1, %p70_p0  ;;  %p258_p7 = scmp.lt.s32.totalorder %s2074_s29, 3 }
  0x14   : > { %p2180_p6 = por %p251_p3, %p70_p0  ;;  %s2076_s12 = smov [#allocation13]  }
  0x15   : > { %s2628_s9 = scalar_select %p2175_p4, 1, 0 }
  0x16   : > { %s2629_s10 = scalar_select %p2180_p6, 1, 0 }
  0x17   : > { %p2185_p8 = pnand %p1583_p5, %p258_p7  ;;  %s270_s13 = sshll.u32 %s2076_s12, 4  ;;  %s271_s13 = int_to_ptr.vmem [resolvable:$true] %s270_s13 }
  0x18   : > { %2630 = sst [smem:[#allocation22_spill]] %s2629_s10  ;;  %s48_s15 = sadd.s32 1, %s2070_s28 }
  0x19   : > { %s2631_s11 = scalar_select %p2185_p8, 1, 0 }
  0x1a   : > { %p1717_p9 = pneg %p2185_p8  ;;  %s2633_s4 = sld [smem:[#allocation27_spill]] }
  0x1c   : > { %p2194_p11 = pnand %p1717_p9, %p2606_p1 }
  0x1e   : > { %p1834_p13 = pneg %p2194_p11 }
  0x20   : > { %s1832_s18 = scalar_lea.hbm %s2633_s4, 512 }
  0x21   : > { %p1833_p12 = scmp.ne.s32.totalorder %s2633_s4, %s1832_s18  ;;  %p1839_p5 = scmp.lt.u32.totalorder %s1832_s18, %s2633_s4 }
  0x23   : > { %p1835_p0 = pnand %p1834_p13, %p1833_p12 }
  0x25   : > { %p1836_p3 = pneg %p1835_p0 }
  0x27   : > { %p1841_p7 = pnand %p1839_p5, %p1836_p3 }
  0x29   : > { %1844 = shalt.err (!%p1841_p7)
}
  0x2a   : > { %s1845_s23 = scalar_lea.vmem %s271_s13, 512  ;;  %p1853_p2 = scmp.lt.s32.totalorder %s271_s13, %s271_s13 }
  0x2b   : > { %p1846_p9 = scmp.ne.s32.totalorder %s271_s13, %s1845_s23  ;;  %p1854_p6 = scmp.lt.s32.totalorder %s1845_s23, %s1845_s23 }
  0x2d   : > { %p1848_p10 = pnand %p1846_p9, %p1834_p13  ;;  %p1855_p4 = por %p1854_p6, %p1853_p2 }
  0x2f   : > { %p1849_p1 = pneg %p1848_p10 }
  0x31   : > { %p1856_p8 = pnand %p1855_p4, %p1849_p1 }
  0x33   : > { %1859 = shalt.err (!%p1856_p8)
}
  0x34   : > { %s2609_s8 = smov 128   ;;  %s2610_s12 = smov 8  }
  0x35   : > { %1720 = dma.hbm_to_vmem [thread:$0]  (!%p2194_p11), %s2633_s4, 512, %s271_s13, [#allocation12], %s2609_s8, %s2609_s8, %s2610_s12  }
  0x36   : > { %p50_p1 = scmp.ge.s32.totalorder %s48_s15, 2  ;;  %s57_s18 = sadd.s32 1, %s2062_s26 }
  0x37   : > { %p64_p2 = scmp.ne.s32.totalorder %s2062_s26, %s2058_s25  ;;  %p65_p4 = scmp.eq.s32.totalorder %s2074_s29, 0 }
  0x38   : > { %s2667_s15 = smov (%p50_p1, %s48_s15), 0  ;;  %p2635_p8 = scmp.eq.s32.totalorder %s2166_s30, 1 }
  0x39   : > { %2634 = sst [smem:[#allocation23_spill]] %s2667_s15  ;;  %p66_p6 = por %p65_p4, %p64_p2 }
  0x3a   : > { %p2226_p10 = por %p2635_p8, %p64_p2  ;;  %s52_s19 = ssub.s32 %s2070_s28, %s2667_s15 }
  0x3b   : > { %p1739_p12 = scmp.lt.s32.totalorder %s2074_s29, 2  ;;  %p55_p13 = scmp.eq.s32.totalorder %s52_s19, 0 }
  0x3c   : > { %s2636_s14 = scalar_select %p2226_p10, 1, 0 }
  0x3d   : > { %s2234_s20 = sand.u32 1, %s2062_s26   ;;  %s2240_s21 = sshll.u32 %s2070_s28, 7 }
  0x3e   : > { %2637 = sst [smem:[#allocation24_spill]] %s2636_s14  ;;  %s2237_s13 = sshll.u32 %s2234_s20, 3 }
  0x3f   : > { %s2243_s22 = scalar_select %p55_p13, %s2062_s26, %s57_s18  }
  0x40   : > { %p2245_p11 = pnand %p1739_p12, %p66_p6  ;;  %s2614_s16 = sand.u32 1, %s2074_s29  }
  0x41   : > { %2638 = sst [smem:[#allocation25_spill]] %s2243_s22  ;;  %s2640_s1 = sld [smem:[#allocation26_spill]] }
  0x42   : > { %s2639_s23 = scalar_select %p2245_p11, 1, 0 }
  0x43   : > { %s313_s12 = scalar_lea.vmem [#allocation8], %s2237_s13  ;;  %s2262_s15 = scalar_lea.sflag [#allocation9], %s2614_s16 }
  0x44   : > { %s321_s4 = sshll.u32 %s313_s12, 4  ;;  %p2268_p3 = pneg %p2245_p11  ;;  %s2257_s4 = int_to_ptr.vmem [resolvable:$true] %s321_s4 }
  0x47   : > { %s2254_s8 = scalar_lea.hbm %s2640_s1, %s2240_s21  ;;  %s1865_s12 = scalar_lea.hbm %s2640_s1, 256 }
  0x48   : > { %s1860_s22 = scalar_lea.hbm %s2254_s8, 128  ;;  %p1866_p9 = scmp.lt.u32.totalorder %s2254_s8, %s2640_s1 }
  0x49   : > { %p1861_p0 = scmp.ne.s32.totalorder %s2254_s8, %s1860_s22  ;;  %p1867_p1 = scmp.lt.u32.totalorder %s1865_s12, %s1860_s22 }
  0x4a   : > { %p1869_p4 = scmp.lt.u32.totalorder %s1860_s22, %s2254_s8 }
  0x4b   : > { %p1863_p5 = pnand %p2268_p3, %p1861_p0  ;;  %p1868_p2 = por %p1867_p1, %p1866_p9 }
  0x4d   : > { %p1864_p7 = pneg %p1863_p5  ;;  %p1870_p6 = por %p1869_p4, %p1868_p2 }
  0x4f   : > { %p1871_p8 = pnand %p1870_p6, %p1864_p7 }
  0x51   : > { %1874 = shalt.err (!%p1871_p8)
}
  0x52   : > { %s1875_s16 = scalar_lea.vmem %s2257_s4, 128  ;;  %s2079_s17 = smov [#allocation8]  }
  0x53   : > { %p1876_p12 = scmp.ne.s32.totalorder %s2257_s4, %s1875_s16  ;;  %s1880_s19 = sshll.u32 %s2079_s17, 4  ;;  %s1881_s19 = int_to_ptr.vmem [resolvable:$false] %s1880_s19 }
  0x54   : > { %s1882_s10 = scalar_lea.vmem %s1881_s19, 256  ;;  %p1883_p5 = scmp.lt.s32.totalorder %s2257_s4, %s1881_s19 }
  0x55   : > { %p1878_p13 = pnand %p1876_p12, %p2268_p3  ;;  %p1884_p10 = scmp.lt.s32.totalorder %s1882_s10, %s1875_s16 }
  0x57   : > { %p1879_p0 = pneg %p1878_p13  ;;  %p1885_p9 = por %p1884_p10, %p1883_p5 }
  0x59   : > { %p1886_p1 = pnand %p1885_p9, %p1879_p0 }
  0x5b   : > { %1889 = shalt.err (!%p1886_p1)
}
  0x5c   : > { %1727 = dma.hbm_to_vmem [thread:$0]  (!%p2245_p11), %s2254_s8, 128, %s2257_s4, %s2262_s15  }
  0x5d   : > { %s2642_s22 = sshll.u32 %s2234_s20, 5  ;;  %s2300_s19 = scalar_lea.hbm %s2598_s0, %s2240_s21 }
  0x5e   : > { %s351_s18 = scalar_lea.vmem [#allocation11], %s2642_s22  ;;  %s294_s10 = scalar_lea.vmem [#allocation5], %s2237_s13 }
  0x5f   : > { %s360_s12 = sshll.u32 %s351_s18, 4  ;;  %s302_s1 = sshll.u32 %s294_s10, 4  ;;  %s2294_s12 = int_to_ptr.vmem [resolvable:$true] %s360_s12  ;;  %s2303_s1 = int_to_ptr.vmem [resolvable:$true] %s302_s1 }
  0x60   : > { %s2309_s8 = scalar_lea.hbm %s2600_s2, %s2240_s21  ;;  %s291_s22 = scalar_lea.sflag [#allocation6], %s2234_s20 }
  0x61   : > { %s1890_s18 = scalar_lea.hbm %s2300_s19, 128  ;;  %s1895_s7 = scalar_lea.hbm %s2598_s0, 256 }
  0x62   : > { %p1891_p10 = scmp.ne.s32.totalorder %s2300_s19, %s1890_s18  ;;  %p1896_p4 = scmp.lt.u32.totalorder %s2300_s19, %s2598_s0 }
  0x63   : > { %p1897_p6 = scmp.lt.u32.totalorder %s1895_s7, %s1890_s18  ;;  %p1899_p12 = scmp.lt.u32.totalorder %s1890_s18, %s2300_s19 }
  0x64   : > { %p1893_p7 = pnand %p1891_p10, %p2268_p3 }
  0x65   : > { %p1898_p8 = por %p1897_p6, %p1896_p4 }
  0x66   : > { %p1894_p2 = pneg %p1893_p7 }
  0x67   : > { %p1900_p13 = por %p1899_p12, %p1898_p8 }
  0x69   : > { %p1901_p0 = pnand %p1900_p13, %p1894_p2 }
  0x6b   : > { %1904 = shalt.err (!%p1901_p0)
}
  0x6c   : > { %s1905_s24 = scalar_lea.vmem %s2303_s1, 128  ;;  %s2080_s20 = smov [#allocation5]  }
  0x6d   : > { %p1906_p5 = scmp.ne.s32.totalorder %s2303_s1, %s1905_s24  ;;  %s1910_s21 = sshll.u32 %s2080_s20, 4  ;;  %s1911_s21 = int_to_ptr.vmem [resolvable:$false] %s1910_s21 }
  0x6e   : > { %s1912_s6 = scalar_lea.vmem %s1911_s21, 256  ;;  %p1913_p10 = scmp.lt.s32.totalorder %s2303_s1, %s1911_s21 }
  0x6f   : > { %p1908_p9 = pnand %p1906_p5, %p2268_p3  ;;  %p1914_p7 = scmp.lt.s32.totalorder %s1912_s6, %s1905_s24 }
  0x71   : > { %p1909_p1 = pneg %p1908_p9  ;;  %p1915_p4 = por %p1914_p7, %p1913_p10 }
  0x73   : > { %p1916_p6 = pnand %p1915_p4, %p1909_p1 }
  0x75   : > { %1919 = shalt.err (!%p1916_p6)
}
  0x76   : > { %1724 = dma.hbm_to_vmem [thread:$0]  (!%p2245_p11), %s2300_s19, 128, %s2303_s1, %s291_s22  }
  0x77   : > { %s332_s7 = scalar_lea.vmem [#allocation10], %s2237_s13  ;;  %s1624_s10 = sshll.u32 %s2070_s28, 9 }
  0x78   : > { %s340_s14 = sshll.u32 %s332_s7, 4  ;;  %s2338_s16 = scalar_lea.hbm %s2601_s3, %s1624_s10  ;;  %s341_s14 = int_to_ptr.vmem [resolvable:$true] %s340_s14 }
  0x79   : > { %s1920_s17 = scalar_lea.hbm %s2309_s8, 128  ;;  %s1925_s21 = scalar_lea.hbm %s2600_s2, 256 }
  0x7a   : > { %p1921_p2 = scmp.ne.s32.totalorder %s2309_s8, %s1920_s17  ;;  %p1926_p13 = scmp.lt.u32.totalorder %s2309_s8, %s2600_s2 }
  0x7b   : > { %p1927_p0 = scmp.lt.u32.totalorder %s1925_s21, %s1920_s17  ;;  %p1929_p9 = scmp.lt.u32.totalorder %s1920_s17, %s2309_s8 }
  0x7c   : > { %p1923_p8 = pnand %p1921_p2, %p2268_p3 }
  0x7d   : > { %p1928_p5 = por %p1927_p0, %p1926_p13 }
  0x7e   : > { %p1924_p12 = pneg %p1923_p8 }
  0x7f   : > { %p1930_p1 = por %p1929_p9, %p1928_p5 }
  0x81   : > { %p1931_p10 = pnand %p1930_p1, %p1924_p12 }
  0x83   : > { %1934 = shalt.err (!%p1931_p10)
}
  0x84   : > { %s1935_s13 = scalar_lea.vmem %s341_s14, 128  ;;  %s2081_s19 = smov [#allocation10]  }
  0x85   : > { %p1936_p7 = scmp.ne.s32.totalorder %s341_s14, %s1935_s13  ;;  %s1940_s22 = sshll.u32 %s2081_s19, 4  ;;  %s1941_s22 = int_to_ptr.vmem [resolvable:$false] %s1940_s22 }
  0x86   : > { %s1942_s7 = scalar_lea.vmem %s1941_s22, 256  ;;  %p1943_p2 = scmp.lt.s32.totalorder %s341_s14, %s1941_s22 }
  0x87   : > { %p1938_p4 = pnand %p1936_p7, %p2268_p3  ;;  %p1944_p8 = scmp.lt.s32.totalorder %s1942_s7, %s1935_s13 }
  0x89   : > { %p1939_p6 = pneg %p1938_p4  ;;  %p1945_p11 = por %p1944_p8, %p1943_p2 }
  0x8b   : > { %p1946_p0 = pnand %p1945_p11, %p1939_p6 }
  0x8d   : > { %1949 = shalt.err (!%p1946_p0)
}
  0x8e   : > { %p2643_p13 = scmp.ne.s32.totalorder %s2639_s23, 0  ;;  %s2644_s10 = sand.u32 1, %s2074_s29  }
  0x8f   : > { %s2360_s4 = scalar_lea.sflag [#allocation12], %s2644_s10  ;;  %s1950_s18 = scalar_lea.hbm %s2338_s16, 512 }
  0x90   : > { %1730 = dma.hbm_to_vmem [thread:$0]  (!%p2643_p13), %s2309_s8, 128, %s341_s14, %s2262_s15  }
  0x91   : > { %p1951_p12 = scmp.ne.s32.totalorder %s2338_s16, %s1950_s18  ;;  %s1955_s20 = scalar_lea.hbm %s2601_s3, 1024 }
  0x92   : > { %p1956_p9 = scmp.lt.u32.totalorder %s2338_s16, %s2601_s3  ;;  %p1957_p1 = scmp.lt.u32.totalorder %s1955_s20, %s1950_s18 }
  0x93   : > { %p1953_p5 = pnand %p1951_p12, %p2268_p3  ;;  %p1959_p7 = scmp.lt.u32.totalorder %s1950_s18, %s2338_s16 }
  0x94   : > { %p1958_p10 = por %p1957_p1, %p1956_p9 }
  0x95   : > { %p1954_p11 = pneg %p1953_p5 }
  0x96   : > { %p1960_p4 = por %p1959_p7, %p1958_p10 }
  0x98   : > { %p1961_p6 = pnand %p1960_p4, %p1954_p11 }
  0x9a   : > { %1964 = shalt.err (!%p1961_p6)
}
  0x9b   : > { %s1965_s15 = scalar_lea.vmem %s2294_s12, 512  ;;  %s2082_s8 = smov [#allocation11]  }
  0x9c   : > { %p1966_p2 = scmp.ne.s32.totalorder %s2294_s12, %s1965_s15  ;;  %s1970_s14 = sshll.u32 %s2082_s8, 4  ;;  %s1971_s14 = int_to_ptr.vmem [resolvable:$false] %s1970_s14 }
  0x9d   : > { %s1972_s1 = scalar_lea.vmem %s1971_s14, 1024  ;;  %p1973_p12 = scmp.lt.s32.totalorder %s2294_s12, %s1971_s14 }
  0x9e   : > { %p1968_p8 = pnand %p1966_p2, %p2268_p3  ;;  %p1974_p5 = scmp.lt.s32.totalorder %s1972_s1, %s1965_s15 }
  0xa0   : > { %p1969_p0 = pneg %p1968_p8  ;;  %p1975_p9 = por %p1974_p5, %p1973_p12 }
  0xa2   : > { %p1976_p1 = pnand %p1975_p9, %p1969_p0 }
  0xa4   : > { %1979 = shalt.err (!%p1976_p1)
}
  0xa5   : > { %s2645_s13 = smov 8   ;;  %s2646_s19 = smov 128  }
  0xa6   : > { %1733 = dma.hbm_to_vmem [thread:$0]  (!%p2643_p13), %s2338_s16, 512, %s2294_s12, %s2360_s4, %s2646_s19, %s2646_s19, %s2645_s13  }
  0xa7   : > { %p2647_p3 = scmp.ne.s32.totalorder %s2631_s11, 0 }
  0xa8   : > { %s2390_s26 = sand.u32 (!%p2647_p3), 1, %s2058_s25   ;;  %p2648_p11 = scmp.ne.s32.totalorder (!%p2647_p3), %s2628_s9, 0 }
  0xa9   : > { %372 = sbr.rel (%p2647_p3) target bundleno = 1767 (0x6e7), region = 48  ;;  %s2393_s22 = sshll.u32 (!%p2647_p3), %s2390_s26, 3 }
  0xaa   : > { %s375_s23 = scalar_lea.sflag (!%p2647_p3), [#allocation6], %s2390_s26  ;;  %s378_s7 = scalar_lea.vmem (!%p2647_p3), [#allocation5], %s2393_s22 }
  0xb0   : > { %2033 = dma.done.wait (%p2648_p11), %s375_s23, 128  }
  0xb1   : > { %2035 = vsyncadd (%p2648_p11), %s375_s23, 4294967168  ;;  %s383_s11 = sand.u32 1, %s2166_s30   ;;  %s387_s16 = scalar_lea.vmem [#allocation8], %s2393_s22 }
  0xb2   : > { %s384_s12 = scalar_lea.sflag [#allocation9], %s383_s11 }
  0xb3   : > { %2037 = dma.done.wait (%p2648_p11), %s384_s12, 256  }
  0xb4   : > { %2039 = vsyncadd (%p2648_p11), %s384_s12, 4294967040  ;;  %s1599_s10 = sshll.u32 %s2390_s26, 5  ;;  %s396_s4 = scalar_lea.vmem [#allocation10], %s2393_s22 }
  0xb5   : > { %s402_s18 = scalar_lea.sflag [#allocation12], %s383_s11  ;;  %s2409_s17 = scalar_lea.vmem [#allocation11], %s1599_s10 }
  0xb6   : > { %2041 = dma.done.wait (%p2648_p11), %s402_s18, 512  }
  0xb7   : > { %2043 = vsyncadd (%p2648_p11), %s402_s18, 4294966784  ;;  %p2649_p13 = scmp.eq.s32.totalorder %s2166_s30, 0 }
  0xb9   : > { %2045 = dma.done.wait (%p2649_p13), [#allocation12], 512   ;;  %p2650_p10 = pmov %p2649_p13 }
  0xba   : > { %vm468_vm0 = vcmask 64512   ;;  %v2083_v0 = vmov 0.0   ;;  %vm2084_vm1 = vmmov 0   ;;  %v474_v1 = vld [vmem:[%s387_s16] sm:$0xff]  ;;  %s2085_s30 = smov 120   ;;  %v473_v2 = vld [vmem:[%s378_s7] sm:$0xff] }
  0xbb   : > { %2047 = vsyncadd (%p2650_p10), [#allocation12], 4294966784  ;;  %1646 = vmatprep.subr.mxu0 %v2083_v0  ;;  %469 = vst.msk [vmem:[#allocation4] sm:$0xff] %vm468_vm0, %v2083_v0  ;;  %1648 = vmatprep.mubr.msk.f32.mxu0 %vm2084_vm1, %v2083_v0  ;;  %s2086_s9 = smov 112   ;;  %s2087_s24 = smov 104   ;;  %v476_v9 = vld [vmem:[%s2409_s17] sm:$0xff] }
  0xbc   : > { %470 = vst.msk [vmem:[#allocation4 + $0x8] sm:$0xff] %vm468_vm0, %v2083_v0  ;;  %471 = vst.msk [vmem:[#allocation4 + $0x10] sm:$0xff] %vm468_vm0, %v2083_v0  ;;  %1656 = vmatprep.subr.mxu1 %v2083_v0  ;;  %1658 = vmatprep.mubr.msk.f32.mxu1 %vm2084_vm1, %v2083_v0  ;;  %vm459_vm2 = vcmask 7168   ;;  %v2088_v13 = vmov -inf   ;;  %v2089_v15 = vmov 0   ;;  %v1605_v16 = vld [vmem:[%s2409_s17 + $0x8] sm:$0xff] }
  0xbd   : > { %472 = vst.msk [vmem:[#allocation4 + $0x18] sm:$0xff] %vm468_vm0, %v2083_v0  ;;  %665 = vrot.lane.b32.xlu0 %v474_v1, %s2085_s30  ;;  %1647 = vmatpush3.xpose.msk.msra.mxu0 %vm468_vm0, %v474_v1  ;;  %v1609_v20 = vld [vmem:[%s2409_s17 + $0x10] sm:$0xff]  ;;  %v1613_v25 = vld [vmem:[%s2409_s17 + $0x18] sm:$0xff]  ;;  %s2090_s20 = smov 8   ;;  %s2091_s21 = smov 16   ;;  %vm1290_vm3 = vcmask 130048  }
  0xbe   : > { %858 = vrot.lane.b32.xlu1 %v474_v1, %s2086_s9  ;;  %1651 = vmatprep.subr.mxu0 %v2083_v0  ;;  %460 = vst.msk [vmem:[#allocation2] sm:$0xff] %vm459_vm2, %v2088_v13  ;;  %461 = vst.msk [vmem:[#allocation2 + $0x8] sm:$0xff] %vm459_vm2, %v2088_v13  ;;  %v475_v35 = vld [vmem:[%s396_s4] sm:$0xff]  ;;  %s2092_s6 = smov 24   ;;  %vm1292_vm4 = vcmask 195584   ;;  %vm1294_vm5 = vcmask 261120  }
  0xbf   : > { %462 = vst.msk [vmem:[#allocation2 + $0x10] sm:$0xff] %vm459_vm2, %v2088_v13  ;;  %463 = vst.msk [vmem:[#allocation2 + $0x18] sm:$0xff] %vm459_vm2, %v2088_v13  ;;  %1804 = vset.pattern.permute.xlu1 %v2089_v15  ;;  %1805 = vset.pattern.permute.xlu0 %v2089_v15  ;;  %s2651_s13 = sld [smem:[#allocation28_spill]]  ;;  %s2652_s19 = sld [smem:[#allocation24_spill]] }
  0xc0   : > { %1649 = vmatmul.mubr.msk.f32.vlgmr.msra.gmra.mrb[0].mxu0 %vm468_vm0, %v473_v2  ;;  %464 = vst.msk [vmem:[#allocation3] sm:$0xff] %vm459_vm2, %v2083_v0  ;;  %465 = vst.msk [vmem:[#allocation3 + $0x8] sm:$0xff] %vm459_vm2, %v2083_v0  ;;  %s1621_s23 = sshll.u32 %s2066_s27, 7  ;;  %s454_s7 = scalar_lea.vmem [#allocation14], %s2393_s22 }
  0xc1   : > { %663 = vrot.lane.b32.xlu0 %v473_v2, %s2085_s30  ;;  %1653 = vmatprep.mubr.msk.f32.mxu0 %vm2084_vm1, %v2083_v0  ;;  %466 = vst.msk [vmem:[#allocation3 + $0x10] sm:$0xff] %vm459_vm2, %v2083_v0  ;;  %467 = vst.msk [vmem:[#allocation3 + $0x18] sm:$0xff] %vm459_vm2, %v2083_v0  ;;  %s1418_s11 = sshll.u32 %s454_s7, 4  ;;  %s2653_s10 = sld [smem:[#allocation29_spill]]  ;;  %s2550_s11 = int_to_ptr.vmem [resolvable:$true] %s1418_s11 }
  0xc2   : > { %856 = vrot.lane.b32.xlu1 %v473_v2, %s2086_s9  ;;  %1652 = vmatpush3.msra.mxu0 %v475_v35  ;;  %s1404_s18 = scalar_lea.sflag [#allocation7], %s2390_s26  ;;  %s1980_s17 = scalar_lea.vmem %s2550_s11, 128 }
  0xc3   : > { %1661 = vmatprep.subr.mxu0 %v2083_v0  ;;  %p1981_p7 = scmp.ne.s32.totalorder %s2550_s11, %s1980_s17  ;;  %s2094_s27 = smov [#allocation14]  }
  0xc4   : > { %s1984_s22 = sshll.u32 %s2094_s27, 4  ;;  %s1985_s22 = int_to_ptr.vmem [resolvable:$false] %s1984_s22 }
  0xc5   : > { %1050 = vrot.lane.b32.xlu0 %v474_v1, %s2087_s24  ;;  %v2483_v31 = vld [vmem:[#allocation2] sm:$0xff]  ;;  %v742_v36 = vld [vmem:[#allocation2 + $0x8] sm:$0xff]  ;;  %p2654_p4 = scmp.ne.s32.totalorder %s2652_s19, 0  ;;  %p1987_p8 = scmp.lt.s32.totalorder %s2550_s11, %s1985_s22 }
  0xc6   : > { %1048 = vrot.lane.b32.xlu1 %v473_v2, %s2087_s24  ;;  %v935_v39 = vld [vmem:[#allocation2 + $0x10] sm:$0xff]  ;;  %v1127_v43 = vld [vmem:[#allocation2 + $0x18] sm:$0xff] }
  0xc7   : > { %s2548_s4 = scalar_lea.hbm %s2653_s10, %s1621_s23  ;;  %p1982_p6 = pnand %p1981_p7, %p2654_p4 }
  0xc9   : > { %p1983_p2 = pneg %p1982_p6 }
 0x12f   : > { %v666_v3 = vpop.permute.xlu0 %665 }
 0x130   : > { %1657 = vmatpush3.xpose.msk.msra.mxu1 %vm468_vm0, %v666_v3  ;;  %v859_v4 = vpop.permute.xlu1 %858 }
 0x131   : > { %1666 = vmatprep.subr.mxu1 %v2083_v0 }
 0x133   : > { %v664_v5 = vpop.permute.xlu0 %663 }
 0x134   : > { %1659 = vmatmul.mubr.msk.f32.vlgmr.msra.gmra.mrb[0].mxu1 %vm468_vm0, %v664_v5  ;;  %v857_v6 = vpop.permute.xlu1 %856 }
 0x135   : > { %1667 = vmatpush3.xpose.msk.msra.mxu1 %vm468_vm0, %v859_v4  ;;  %1668 = vmatprep.mubr.msk.f32.mxu1 %vm2084_vm1, %v2083_v0 }
 0x136   : > { %1676 = vmatprep.subr.mxu1 %v2083_v0 }
 0x137   : > { %v1051_v7 = vpop.permute.xlu0 %1050 }
 0x138   : > { %1669 = vmatmul.mubr.msk.f32.vlgmr.msra.gmra.mrb[2].mxu1 %vm468_vm0, %v857_v6  ;;  %v1049_v8 = vpop.permute.xlu1 %1048 }
 0x139   : > { %1677 = vmatpush3.xpose.msk.msra.mxu1 %vm468_vm0, %v1051_v7  ;;  %1678 = vmatprep.mubr.msk.f32.mxu1 %vm2084_vm1, %v2083_v0 }
 0x13c   : > { %1679 = vmatmul.mubr.msk.f32.vlgmr.msra.gmra.mrb[4].mxu1 %vm468_vm0, %v1049_v8 }
 0x13d   : > { %1694 = vmatprep.mubr.msk.f32.mxu1 %vm2084_vm1, %v2083_v0 }
 0x193   : > { %v550_v10 = vpop.f32.mrb[0].mxu0 }
 0x194   : > { %v2461_v11 = vadd.f32 %v550_v10, %v476_v9  ;;  %v1650_v12 = vpop.f32.mrb[1].mxu0 }
 0x196   : > { %v556_v14 = vsel %vm468_vm0, %v2461_v11, -inf }
 0x197   : > { %557 = vmax.xlane.f32.xlu0 %v556_v14 }
 0x207   : > { %v737_v17 = vpop.f32.mrb[0].mxu1 }
 0x208   : > { %v738_v18 = vadd.f32 %v1605_v16, %v737_v17  ;;  %v1660_v19 = vpop.f32.mrb[1].mxu1  ;;  %v744_v16 = vld [vmem:[#allocation3 + $0x8] sm:$0xff] }
 0x209   : > { %v937_v19 = vld [vmem:[#allocation3 + $0x10] sm:$0xff] }
 0x20a   : > { %v745_v21 = vsel %vm468_vm0, %v738_v18, -inf }
 0x20b   : > { %746 = vmax.xlane.f32.xlu1 %v745_v21  ;;  %v930_v22 = vpop.f32.mrb[2].mxu1 }
 0x20c   : > { %v931_v23 = vadd.f32 %v1609_v20, %v930_v22  ;;  %v1670_v24 = vpop.f32.mrb[3].mxu1 }
 0x20e   : > { %v938_v26 = vsel %vm468_vm0, %v931_v23, -inf }
 0x20f   : > { %v1122_v27 = vpop.f32.mrb[4].mxu1  ;;  %939 = vmax.xlane.f32.xlu0 %v938_v26 }
 0x210   : > { %v1123_v28 = vadd.f32 %v1613_v25, %v1122_v27  ;;  %v1680_v29 = vpop.f32.mrb[5].mxu1 }
 0x212   : > { %v1130_v30 = vsel %vm468_vm0, %v1123_v28, -inf }
 0x213   : > { %1131 = vmax.xlane.f32.xlu0 %v1130_v30 }
 0x224   : > { %v558_v32 = vpop.xlane.xlu0 %557 }
 0x225   : > { %v2486_v33 = vmax.f32 %v2483_v31, %v558_v32 }
 0x227   : > { %v560_v34 = vsub.f32 %v2483_v31, %v2486_v33  ;;  %660 = vst.msk [vmem:[#allocation2] sm:$0xff] %vm459_vm2, %v2486_v33  ;;  %565 = vperm.xlu1 %1804, %v2486_v33  }
 0x229   : > { %v561_v15 = vmul.f32 1.442695, %v560_v34 }
 0x298   : > { %v747_v37 = vpop.xlane.xlu1 %746 }
 0x299   : > { %v748_v38 = vmax.f32 %v742_v36, %v747_v37  ;;  %v767_v37 = vld [vmem:[#allocation4 + $0x8] sm:$0xff] }
 0x29b   : > { %v749_v40 = vsub.f32 %v742_v36, %v748_v38  ;;  %853 = vst.msk [vmem:[#allocation2 + $0x8] sm:$0xff] %vm459_vm2, %v748_v38  ;;  %754 = vperm.xlu0 %1805, %v748_v38  }
 0x29c   : > { %v940_v41 = vpop.xlane.xlu0 %939 }
 0x29d   : > { %v941_v42 = vmax.f32 %v935_v39, %v940_v41  ;;  %v750_v7 = vmul.f32 1.442695, %v749_v40  ;;  %v960_v40 = vld [vmem:[#allocation4 + $0x10] sm:$0xff] }
 0x29f   : > { %v942_v44 = vsub.f32 %v935_v39, %v941_v42  ;;  %1045 = vst.msk [vmem:[#allocation2 + $0x10] sm:$0xff] %vm459_vm2, %v941_v42  ;;  %947 = vperm.xlu1 %1804, %v941_v42  }
 0x2a0   : > { %v1132_v45 = vpop.xlane.xlu0 %1131 }
 0x2a1   : > { %v1133_v46 = vmax.f32 %v1127_v43, %v1132_v45  ;;  %v943_v9 = vmul.f32 1.442695, %v942_v44 }
 0x2a3   : > { %v1134_v47 = vsub.f32 %v1127_v43, %v1133_v46  ;;  %1237 = vst.msk [vmem:[#allocation2 + $0x18] sm:$0xff] %vm459_vm2, %v1133_v46  ;;  %1139 = vperm.xlu1 %1804, %v1133_v46   ;;  %v1152_v46 = vld [vmem:[#allocation4 + $0x18] sm:$0xff] }
 0x2a5   : > { %v1135_v10 = vmul.f32 1.442695, %v1134_v47 }
 0x2a6   : > { %v566_v48 = vpop.permute.xlu1 %565 }
 0x2a7   : > { %v568_v49 = vsub.f32 %v2461_v11, %v566_v48  ;;  %775 = vrot.lane.b32.xlu1 %v475_v35, %s2085_s30  ;;  %s1986_s30 = scalar_lea.vmem %s1985_s22, 256 }
 0x2a8   : > { %p1988_p0 = scmp.lt.s32.totalorder %s1986_s30, %s1980_s17 }
 0x2a9   : > { %v569_v50 = vmul.f32 1.442695, %v568_v49 }
 0x2aa   : > { %p1989_p12 = por %p1988_p0, %p1987_p8 }
 0x2ab   : > { %1806 = vpow2.f32 %v569_v50  ;;  %967 = vrot.lane.b32.xlu1 %v475_v35, %s2086_s9 }
 0x2ac   : > { %p1990_p5 = pnand %p1989_p12, %p1983_p2 }
 0x2af   : > { %1159 = vrot.lane.b32.xlu1 %v475_v35, %s2087_s24 }
 0x2b5   : > { %v1807_v51 = vpop.eup %1806 }
 0x2b6   : > { %1654 = vmatmul.mubr.msk.f32.vlgmr.msra.gmra.mrb[2].mxu0 %vm468_vm0, %v1807_v51  ;;  %v572_v8 = vsel %vm468_vm0, %v1807_v51, 0.0 }
 0x2b7   : > { %1663 = vmatprep.mubr.msk.f32.mxu0 %vm2084_vm1, %v2083_v0 }
 0x31a   : > { %v755_v52 = vpop.permute.xlu0 %754 }
 0x31b   : > { %v757_v53 = vsub.f32 %v738_v18, %v755_v52 }
 0x31d   : > { %v758_v54 = vmul.f32 1.442695, %v757_v53 }
 0x31e   : > { %v948_v55 = vpop.permute.xlu1 %947 }
 0x31f   : > { %1808 = vpow2.f32 %v758_v54  ;;  %v950_v56 = vsub.f32 %v931_v23, %v948_v55  ;;  %v1129_v23 = vld [vmem:[#allocation3 + $0x18] sm:$0xff] }
 0x321   : > { %v951_v57 = vmul.f32 1.442695, %v950_v56 }
 0x322   : > { %v1140_v58 = vpop.permute.xlu1 %1139 }
 0x323   : > { %1810 = vpow2.f32 %v951_v57  ;;  %v1142_v59 = vsub.f32 %v1123_v28, %v1140_v58  ;;  %v555_v28 = vld [vmem:[#allocation3] sm:$0xff] }
 0x324   : > { %v578_v57 = vld [vmem:[#allocation4] sm:$0xff] }
 0x325   : > { %v1143_v60 = vmul.f32 1.442695, %v1142_v59 }
 0x326   : > { %v776_v61 = vpop.permute.xlu1 %775 }
 0x327   : > { %1812 = vpow2.f32 %v1143_v60  ;;  %1662 = vmatpush3.msra.mxu0 %v776_v61 }
 0x328   : > { %1671 = vmatprep.subr.mxu0 %v2083_v0  ;;  %1814 = vpow2.f32 %v750_v7 }
 0x329   : > { %v1809_v62 = vpop.eup %1808  ;;  %1816 = vpow2.f32 %v943_v9 }
 0x32a   : > { %1664 = vmatmul.mubr.msk.f32.vlgmr.msra.gmra.mrb[4].mxu0 %vm468_vm0, %v1809_v62  ;;  %v761_v63 = vsel %vm468_vm0, %v1809_v62, 0.0  ;;  %v968_v1 = vpop.permute.xlu1 %967  ;;  %1818 = vpow2.f32 %v1135_v10 }
 0x32b   : > { %762 = vadd.xlane.f32.xlu1 %v761_v63  ;;  %1672 = vmatpush3.msra.mxu0 %v968_v1  ;;  %1820 = vpow2.f32 %v561_v15 }
 0x32c   : > { %1673 = vmatprep.mubr.msk.f32.mxu0 %vm2084_vm1, %v2083_v0  ;;  %1681 = vmatprep.subr.mxu0 %v2083_v0 }
 0x32d   : > { %v1811_v2 = vpop.eup %1810 }
 0x32e   : > { %1674 = vmatmul.mubr.msk.f32.vlgmr.msra.gmra.mrb[6].mxu0 %vm468_vm0, %v1811_v2  ;;  %v954_v3 = vsel %vm468_vm0, %v1811_v2, 0.0  ;;  %v1160_v4 = vpop.permute.xlu1 %1159 }
 0x32f   : > { %955 = vadd.xlane.f32.xlu0 %v954_v3  ;;  %1682 = vmatpush3.msra.mxu0 %v1160_v4 }
 0x330   : > { %1683 = vmatprep.mubr.msk.f32.mxu0 %vm2084_vm1, %v2083_v0 }
 0x331   : > { %v1813_v5 = vpop.eup %1812 }
 0x332   : > { %1684 = vmatmul.mubr.msk.f32.vlgmr.msra.gmra.mrb[8].mxu0 %vm468_vm0, %v1813_v5  ;;  %v1146_v6 = vsel %vm468_vm0, %v1813_v5, 0.0  ;;  %v1815_v11 = vpop.eup %1814 }
 0x333   : > { %1147 = vadd.xlane.f32.xlu1 %v1146_v6  ;;  %v1817_v12 = vpop.eup %1816  ;;  %v760_v17 = vmul.f32 %v1815_v11, %v744_v16 }
 0x334   : > { %v1819_v13 = vpop.eup %1818  ;;  %v953_v21 = vmul.f32 %v1817_v12, %v937_v19 }
 0x335   : > { %v1145_v25 = vmul.f32 %v1819_v13, %v1129_v23  ;;  %v1821_v26 = vpop.eup %1820  ;;  %v1325_v23 = vld [vmem:[#allocation13] sm:$0xff] }
 0x336   : > { %v571_v31 = vmul.f32 %v1821_v26, %v555_v28  ;;  %v1328_v28 = vld [vmem:[#allocation13 + $0x18] sm:$0xff] }
 0x337   : > { %573 = vadd.xlane.f32.xlu1 %v572_v8 }
 0x345   : > { %770 = vperm.xlu0 %1805, %v1815_v11  }
 0x348   : > { %963 = vperm.xlu1 %1804, %v1817_v12  }
 0x349   : > { %1155 = vperm.xlu0 %1805, %v1819_v13  }
 0x389   : > { %v2519_v0 = vpop.f32.mrb[2].mxu0 }
 0x38a   : > { %v1655_v14 = vpop.f32.mrb[3].mxu0 }
 0x3b8   : > { %v763_v18 = vpop.xlane.xlu1 %762 }
 0x3b9   : > { %v764_v20 = vadd.f32 %v763_v18, %v760_v17 }
 0x3bb   : > { %765 = vst.msk [vmem:[#allocation3 + $0x8] sm:$0xff] %vm459_vm2, %v764_v20 }
 0x3bc   : > { %v956_v22 = vpop.xlane.xlu0 %955 }
 0x3bd   : > { %v957_v24 = vadd.f32 %v956_v22, %v953_v21 }
 0x3bf   : > { %958 = vst.msk [vmem:[#allocation3 + $0x10] sm:$0xff] %vm459_vm2, %v957_v24  ;;  %v1326_v24 = vld [vmem:[#allocation13 + $0x8] sm:$0xff] }
 0x3c0   : > { %v1148_v27 = vpop.xlane.xlu1 %1147 }
 0x3c1   : > { %v1149_v29 = vadd.f32 %v1148_v27, %v1145_v25  ;;  %v1698_v25 = vpack.c.bf16 %v1326_v24, %v1325_v23  ;;  %v1327_v27 = vld [vmem:[#allocation13 + $0x10] sm:$0xff] }
 0x3c2   : > { %v1251_v30 = vld [vmem:[#allocation3 + $0x8] sm:$0xff] }
 0x3c3   : > { %1150 = vst.msk [vmem:[#allocation3 + $0x18] sm:$0xff] %vm459_vm2, %v1149_v29  ;;  %1254 = vperm.xlu1 %1804, %v1251_v30   ;;  %v1701_v29 = vpack.c.bf16 %v1328_v28, %v1327_v27 }
 0x3c4   : > { %v574_v32 = vpop.xlane.xlu1 %573  ;;  %v771_v38 = vpop.permute.xlu0 %770 }
 0x3c5   : > { %v575_v33 = vadd.f32 %v574_v32, %v571_v31  ;;  %v773_v39 = vmul.f32 %v771_v38, %v767_v37 }
 0x3c6   : > { %v1260_v34 = vld [vmem:[#allocation3 + $0x10] sm:$0xff] }
 0x3c7   : > { %577 = vst.msk [vmem:[#allocation3] sm:$0xff] %vm459_vm2, %v575_v33  ;;  %1263 = vperm.xlu1 %1804, %v1260_v34   ;;  %v1617_v34 = vld [vmem:[%s2603_s5] ss:$0 sm:$0xff] }
 0x3c8   : > { %v964_v41 = vpop.permute.xlu1 %963  ;;  %v1156_v47 = vpop.permute.xlu0 %1155 }
 0x3c9   : > { %v966_v45 = vmul.f32 %v964_v41, %v960_v40  ;;  %v1158_v51 = vmul.f32 %v1156_v47, %v1152_v46 }
 0x3ca   : > { %v1269_v35 = vld [vmem:[#allocation3 + $0x18] sm:$0xff] }
 0x3cb   : > { %1272 = vperm.xlu0 %1805, %v1269_v35   ;;  %581 = vperm.xlu1 %1804, %v1821_v26   ;;  %v2093_v26 = vmov 0.0|0.0  }
 0x3cc   : > { %1697 = vmatprep.subr.bf16.mxu1 %v2093_v26 }
 0x3cd   : > { %1699 = vmatpush3.bf16.msra.mxu1 %v1698_v25 }
 0x3ce   : > { %v1242_v36 = vld [vmem:[#allocation3] sm:$0xff]  ;;  %1700 = vmatprep.subr.bf16.mxu1 %v2093_v26 }
 0x3cf   : > { %1245 = vperm.xlu0 %1805, %v1242_v36   ;;  %v1618_v36 = vld [vmem:[%s2651_s13] ss:$0 sm:$0xff] }
 0x3d1   : > { %1702 = vmatpush3.bf16.msra.mxu1 %v1701_v29 }
 0x3fd   : > { %v847_v42 = vpop.f32.mrb[4].mxu0 }
 0x3fe   : > { %v851_v43 = vadd.f32 %v847_v42, %v773_v39  ;;  %v1665_v44 = vpop.f32.mrb[5].mxu0 }
 0x400   : > { %852 = vst.msk [vmem:[#allocation4 + $0x8] sm:$0xff] %vm468_vm0, %v851_v43 }
 0x401   : > { %v1039_v48 = vpop.f32.mrb[6].mxu0 }
 0x402   : > { %v1043_v49 = vadd.f32 %v1039_v48, %v966_v45  ;;  %v1675_v50 = vpop.f32.mrb[7].mxu0 }
 0x404   : > { %1044 = vst.msk [vmem:[#allocation4 + $0x10] sm:$0xff] %vm468_vm0, %v1043_v49 }
 0x405   : > { %v1231_v52 = vpop.f32.mrb[8].mxu0 }
 0x406   : > { %v1235_v53 = vadd.f32 %v1231_v52, %v1158_v51  ;;  %v1685_v54 = vpop.f32.mrb[9].mxu0 }
 0x407   : > { %v1250_v63 = vld [vmem:[#allocation4 + $0x8] sm:$0xff] }
 0x408   : > { %1236 = vst.msk [vmem:[#allocation4 + $0x18] sm:$0xff] %vm468_vm0, %v1235_v53 }
 0x40b   : > { %v1259_v3 = vld [vmem:[#allocation4 + $0x10] sm:$0xff] }
 0x40f   : > { %v1268_v6 = vld [vmem:[#allocation4 + $0x18] sm:$0xff] }
 0x442   : > { %v1255_v55 = vpop.permute.xlu1 %1254 }
 0x443   : > { %1822 = vrcp.f32 %v1255_v55 }
 0x446   : > { %v1264_v56 = vpop.permute.xlu1 %1263 }
 0x447   : > { %1824 = vrcp.f32 %v1264_v56 }
 0x44a   : > { %v1273_v58 = vpop.permute.xlu0 %1272  ;;  %v582_v59 = vpop.permute.xlu1 %581 }
 0x44b   : > { %1826 = vrcp.f32 %v1273_v58  ;;  %v584_v60 = vmul.f32 %v582_v59, %v578_v57 }
 0x44d   : > { %v1823_v61 = vpop.eup %1822  ;;  %v658_v62 = vadd.f32 %v2519_v0, %v584_v60 }
 0x44e   : > { %v1258_v1 = vmul.f32 %v1823_v61, %v1250_v63  ;;  %v1246_v8 = vpop.permute.xlu0 %1245 }
 0x44f   : > { %659 = vst.msk [vmem:[#allocation4] sm:$0xff] %vm468_vm0, %v658_v62  ;;  %1828 = vrcp.f32 %v1246_v8 }
 0x450   : > { %1278 = vrot.lane.b32.xlu1 %v1258_v1, %s2090_s20 }
 0x451   : > { %v1825_v2 = vpop.eup %1824 }
 0x452   : > { %v1267_v4 = vmul.f32 %v1825_v2, %v1259_v3 }
 0x454   : > { %1282 = vrot.lane.b32.xlu0 %v1267_v4, %s2091_s21 }
 0x455   : > { %v1827_v5 = vpop.eup %1826 }
 0x456   : > { %v1276_v7 = vmul.f32 %v1827_v5, %v1268_v6  ;;  %v1241_v10 = vld [vmem:[#allocation4] sm:$0xff] }
 0x458   : > { %1286 = vrot.lane.b32.xlu1 %v1276_v7, %s2092_s6 }
 0x459   : > { %v1829_v9 = vpop.eup %1828 }
 0x45a   : > { %v1249_v12 = vmul.f32 %v1829_v9, %v1241_v10 }
 0x4c2   : > { %v1279_v11 = vpop.permute.xlu1 %1278 }
 0x4c3   : > { %v1289_v0 = vsel %vm468_vm0, %v1249_v12, %v1279_v11 }
 0x4c6   : > { %v1283_v13 = vpop.permute.xlu0 %1282 }
 0x4c7   : > { %v1291_v14 = vsel %vm1290_vm3, %v1289_v0, %v1283_v13 }
 0x4ca   : > { %v1287_v15 = vpop.permute.xlu1 %1286 }
 0x4cb   : > { %v1293_v16 = vsel %vm1292_vm4, %v1291_v14, %v1287_v15 }
 0x4cc   : > { %v1295_v17 = vsel %vm1294_vm5, %v1293_v16, 0.0 }
 0x4cd   : > { %1296 = vadd.xlane.f32.xlu0 %v1295_v17 }
 0x55a   : > { %v1297_v18 = vpop.xlane.xlu0 %1296 }
 0x55b   : > { %v1299_v19 = vmul.f32 0.03125, %v1297_v18 }
 0x55d   : > { %v1300_v20 = vsub.f32 %v1293_v16, %v1299_v19 }
 0x55f   : > { %v1301_v21 = vmul.f32 %v1300_v20, %v1300_v20 }
 0x561   : > { %v1302_v22 = vsel %vm1294_vm5, %v1301_v21, 0.0 }
 0x562   : > { %1303 = vadd.xlane.f32.xlu1 %v1302_v22 }
 0x5ef   : > { %v1304_v30 = vpop.xlane.xlu1 %1303 }
 0x5f0   : > { %v1305_v31 = vmul.f32 0.03125, %v1304_v30 }
 0x5f2   : > { %v1306_v32 = vadd.f32 1e-05, %v1305_v31 }
 0x5f4   : > { %1830 = vrsqrt.f32 %v1306_v32 }
 0x5fe   : > { %v1831_v33 = vpop.eup %1830 }
 0x5ff   : > { %v1308_v35 = vmul.f32 %v1831_v33, %v1300_v20 }
 0x601   : > { %v1316_v37 = vmul.f32 %v1617_v34, %v1308_v35 }
 0x603   : > { %v1324_v38 = vadd.f32 %v1618_v36, %v1316_v37 }
 0x605   : > { %1695 = vmatmul.mubr.msk.f32.vlgmr.msra.gmra.mrb[6].mxu1 %vm1294_vm5, %v1324_v38 }
 0x6d8   : > { %v1398_v39 = vpop.f32.mrb[6].mxu1 }
 0x6d9   : > { %1402 = vst.msk [vmem:[%s454_s7] sm:$0xff] %vm1294_vm5, %v1398_v39  ;;  %v1696_v40 = vpop.f32.mrb[7].mxu1 }
 0x6da   : > { %1993 = shalt.err (!%p1990_p5)
}
 0x6db   : > { %s1994_s26 = scalar_lea.hbm %s2548_s4, 128  ;;  %s1998_s20 = scalar_lea.hbm %s2653_s10, 256 }
 0x6dc   : > { %p1995_p9 = scmp.ne.s32.totalorder %s2548_s4, %s1994_s26  ;;  %p1999_p11 = scmp.lt.u32.totalorder %s2548_s4, %s2653_s10 }
 0x6dd   : > { %p2000_p13 = scmp.lt.u32.totalorder %s1998_s20, %s1994_s26  ;;  %p2002_p7 = scmp.lt.u32.totalorder %s1994_s26, %s2548_s4 }
 0x6de   : > { %p1996_p1 = pnand %p1995_p9, %p2654_p4 }
 0x6df   : > { %p2001_p10 = por %p2000_p13, %p1999_p11 }
 0x6e0   : > { %p1997_p3 = pneg %p1996_p1 }
 0x6e1   : > { %p2003_p6 = por %p2002_p7, %p2001_p10 }
 0x6e3   : > { %p2004_p2 = pnand %p2003_p6, %p1997_p3 }
 0x6e5   : > { %2007 = shalt.err (!%p2004_p2)
}
 0x6e6   : > { %1715 = dma.vmem_to_hbm [thread:$0]  (%p2654_p4), %s2550_s11, 128, %s2548_s4, %s1404_s18  }
 0x6e7 PF: > { %s2655_s15 = sld [smem:[#allocation20_spill]]  ;;  %s2656_s8 = sld [smem:[#allocation22_spill]] }
 0x6e8   : > { %p2658_p0 = scmp.ge.s32.totalorder %s2074_s29, 2 }
 0x6ed   : > { %s1430_s14 = sand.u32 1, %s2655_s15   ;;  %p2657_p8 = scmp.ne.s32.totalorder %s2656_s8, 0 }
 0x6ee   : > { %s1431_s1 = scalar_lea.sflag [#allocation7], %s1430_s14 }
 0x6ef   : > { %p1735_p12 = pnand %p2658_p0, %p2657_p8 }
 0x6f1   : > { %2049 = dma.done.wait (!%p1735_p12), %s1431_s1, 128  }
 0x6f2   : > { %2051 = vsyncadd (!%p1735_p12), %s1431_s1, 4294967168  ;;  %s29_s29 = sadd.s32 1, %s2074_s29   ;;  %s2659_s13 = sld [smem:[#allocation21_spill]] }
 0x6f3   : > { %p26_p5 = scmp.ge.s32.totalorder %s29_s29, 4   ;;  %s2660_s26 = sld [smem:[#allocation25_spill]] }
 0x6f4   : > { %s2661_s19 = sld [smem:[#allocation23_spill]]  ;;  %s2662_s24 = smov %s2058_s25 }
 0x6f5   : > { %s2664_s27 = smov %s2070_s28  ;;  %28 = sbr.rel (!%p26_p5) target bundleno = 15 (0xf), region = 154 }
 0x6f8   : > { %s2663_s25 = smov %s2659_s13 }
 0x6fa   : > { %s2665_s28 = smov %s2661_s19 }
 0x6fc   :  { %1436 = vsyncpa [#allocation6], 1 }
 0x6fd   :  { %1438 = vsyncpa [#allocation6 + $0x1], 1 }
 0x6fe   :  { %1439 = vsyncpa [#allocation9], 1 }
 0x6ff   :  { %1441 = vsyncpa [#allocation9 + $0x1], 1 }
 0x700   :  { %1442 = vsyncpa [#allocation12], 1 }
 0x701   :  { %1444 = vsyncpa [#allocation12 + $0x1], 1 }
 0x702   :  { %1445 = vsyncpa [#allocation7], 1 }
 0x703   :  { %1447 = vsyncpa [#allocation7 + $0x1], 1 }

</bundles_post_ra>
